<compile_context>
chip_gen: v6e
topology: v6e:2x2x1
jax: 0.10.0
libtpu: 0.0.40
codegen_flags: <defaults>
</compile_context>

<pallas_src>
import functools

import jax
import jax.numpy as jnp
from jax.experimental import pallas as pl
from jax.experimental.pallas import tpu as pltpu

EMBD = 256
HIDDEN = EMBD * 4
DROP = 0.1
_DROP_THRESHOLD = int(DROP * 4294967296.0)  # drop iff uint32 bits < threshold
_INV_KEEP = 1.0 / (1.0 - DROP)


def _uniform_bits(shape, tm, seed):
    """uint32 bits from a splitmix32/lowbias32 hash of the global element index.

    Portable (pure jnp): works under interpret mode and Mosaic.  Stable across
    tile-size changes because the hash input is the global (row, col) index.
    """
    row = jax.lax.broadcasted_iota(jnp.int32, shape, 0)
    col = jax.lax.broadcasted_iota(jnp.int32, shape, 1)
    gidx = (pl.program_id(0) * tm + row) * EMBD + col
    salt = jnp.uint32((int(seed) * 0x9E3779B1 + 0x85EBCA6B) & 0xFFFFFFFF)
    x = gidx.astype(jnp.uint32) ^ salt
    x = (x ^ (x >> 16)) * jnp.uint32(0x7FEB352D)
    x = (x ^ (x >> 15)) * jnp.uint32(0x846CA68B)
    x = x ^ (x >> 16)
    return x


def _ffn_kernel(x_ref, w1_ref, b1_ref, w2_ref, b2_ref, o_ref, *,
                training, seed, bf16_epilogue, tm):
    # x_ref: (tm, EMBD) f32, w1_ref: (EMBD, HIDDEN) bf16, b1_ref: (1, HIDDEN) f32
    # w2_ref: (HIDDEN, EMBD) bf16, b2_ref: (1, EMBD) f32, o_ref: (tm, EMBD)

    # In-kernel f32 -> bf16 cast (cheap VPU work hidden under the MXU); keeps
    # the HBM x stream f32-read-once instead of an extra wrapper cast pass.
    x = x_ref[...].astype(jnp.bfloat16)

    # Linear 1: bf16 operands on the MXU, f32 accumulate.
    h = jnp.dot(x, w1_ref[...], preferred_element_type=jnp.float32)

    if bf16_epilogue:
        # bf16 bias+ReLU epilogue (v6e/v7x: halves VALU work on the (tm,1024)
        # hidden activation and drops the separate f32->bf16 cast).
        hb = jnp.maximum(h.astype(jnp.bfloat16) + b1_ref[...].astype(jnp.bfloat16),
                         jnp.bfloat16(0))
    else:
        # f32 epilogue for chips without a bf16 VALU (v5e and older).
        hb = jnp.maximum(h + b1_ref[...], 0.0).astype(jnp.bfloat16)

    # Linear 2: bf16 back into the MXU, f32 accumulate, f32 bias add.
    y = jnp.dot(hb, w2_ref[...], preferred_element_type=jnp.float32)
    y = y + b2_ref[...]

    if training:
        bits = _uniform_bits(y.shape, tm, seed)
        keep = bits >= jnp.uint32(_DROP_THRESHOLD)
        y = jnp.where(keep, y * _INV_KEEP, 0.0)

    o_ref[...] = y.astype(o_ref.dtype)


def _use_bf16_epilogue():
    """bf16 VALU exists on v6e/v7x; keep the f32 epilogue on v5e and older."""
    try:
        kind = jax.devices()[0].device_kind.lower()
    except Exception:
        return True
    no_bf16_valu = ("v2", "v3", "v4", "v5 lite", "v5lite", "v5e")
    return not any(tag in kind for tag in no_bf16_valu)


def _pick_tm(M):
    """Row-tile size.

    M <= 1024: one full-size grid step (best on single-TC chips; tiny work
    anyway).  Larger M: largest of {1024, 512, 256} preferring an EVEN number
    of grid steps (v7x megacore balance) and minimal tail waste.
    """
    if M <= 1024:
        return M
    best = None
    for tm in (1024, 512, 256):
        n = pl.cdiv(M, tm)
        waste = n * tm - M
        key = (n % 2 != 0, waste, -tm)   # prefer even count, low waste, big tile
        if best is None or key < best[0]:
            best = (key, tm)
    return best[1]


def feed_forward(x, w1, b1, w2, b2, *, training=False, seed=0, tm=None,
                 bf16_epilogue=None, out_dtype=None):
    """x: (B, T, EMBD) -> (B, T, EMBD). Weights in (in, out) layout.

    Pass w1/w2 already in bf16 (persist them that way) to avoid a per-call cast.
    Use a distinct `seed` per layer / per training step.
    """
    B, T, E = x.shape
    assert E == EMBD
    M = B * T
    if tm is None:
        tm = _pick_tm(M)
    if bf16_epilogue is None:
        bf16_epilogue = _use_bf16_epilogue()
    if out_dtype is None:
        out_dtype = x.dtype

    num_tiles = pl.cdiv(M, tm)           # no padding copy; tail block is masked

    x2 = x.reshape(M, E)                 # f32; cast to bf16 happens in-kernel
    # Fallback casts only (prefer passing bf16 weights; see docstring).
    if w1.dtype != jnp.bfloat16:
        w1 = w1.astype(jnp.bfloat16)
    if w2.dtype != jnp.bfloat16:
        w2 = w2.astype(jnp.bfloat16)
    b1_2 = b1.reshape(1, HIDDEN).astype(jnp.float32)
    b2_2 = b2.reshape(1, EMBD).astype(jnp.float32)

    kernel = functools.partial(_ffn_kernel, training=training, seed=int(seed),
                               bf16_epilogue=bf16_epilogue, tm=tm)

    out = pl.pallas_call(
        kernel,
        out_shape=jax.ShapeDtypeStruct((M, EMBD), out_dtype),
        grid_spec=pltpu.PrefetchScalarGridSpec(
            num_scalar_prefetch=0,
            grid=(num_tiles,),
            in_specs=[
                pl.BlockSpec((tm, EMBD), lambda i: (i, 0)),      # x tile
                pl.BlockSpec((EMBD, HIDDEN), lambda i: (0, 0)),  # w1 (resident)
                pl.BlockSpec((1, HIDDEN), lambda i: (0, 0)),     # b1
                pl.BlockSpec((HIDDEN, EMBD), lambda i: (0, 0)),  # w2 (resident)
                pl.BlockSpec((1, EMBD), lambda i: (0, 0)),       # b2
            ],
            out_specs=pl.BlockSpec((tm, EMBD), lambda i: (i, 0)),
        ),
        compiler_params=pltpu.CompilerParams(
            dimension_semantics=("parallel",),
            vmem_limit_bytes=32 * 1024 * 1024,   # v5e default scoped limit is 16 MiB
        ),
    )(x2, w1, b1_2, w2, b2_2)

    return out.reshape(B, T, EMBD)


def init_params(key):
    """Deterministic init mimicking torch.nn.Linear (uniform +/- 1/sqrt(fan_in))."""
    k1, k2, k3, k4 = jax.random.split(key, 4)
    lim1 = 1.0 / jnp.sqrt(EMBD)
    lim2 = 1.0 / jnp.sqrt(HIDDEN)
    # torch stores weight as (out, in); we keep (in, out) so the kernel does x @ W.
    w1 = jax.random.uniform(k1, (EMBD, HIDDEN), jnp.float32, -lim1, lim1)
    b1 = jax.random.uniform(k2, (HIDDEN,), jnp.float32, -lim1, lim1)
    w2 = jax.random.uniform(k3, (HIDDEN, EMBD), jnp.float32, -lim2, lim2)
    b2 = jax.random.uniform(k4, (EMBD,), jnp.float32, -lim2, lim2)
    return w1, b1, w2, b2


def _reference_bf16(x, w1, b1, w2, b2, bf16_epilogue):
    """Plain-JAX reference with the same bf16-operand / f32-accumulate recipe."""
    xb = x.reshape(-1, EMBD).astype(jnp.bfloat16)
    h = jnp.dot(xb, w1.astype(jnp.bfloat16), preferred_element_type=jnp.float32)
    if bf16_epilogue:
        hb = jnp.maximum(h.astype(jnp.bfloat16) + b1.astype(jnp.bfloat16),
                         jnp.bfloat16(0))
    else:
        hb = jnp.maximum(h + b1, 0.0).astype(jnp.bfloat16)
    y = jnp.dot(hb, w2.astype(jnp.bfloat16), preferred_element_type=jnp.float32) + b2
    return y.reshape(x.shape)


if __name__ == "__main__":
    key = jax.random.PRNGKey(0)
    kx, kp = jax.random.split(key)

    B, T = 2, 8  # small shapes; M = 16 tokens -> tm=16, single grid step
    x = jax.random.normal(kx, (B, T, EMBD), jnp.float32)
    w1, b1, w2, b2 = init_params(kp)

    # Persist the matmul weights in bf16 once (no per-call wrapper casts).
    w1_bf = w1.astype(jnp.bfloat16)
    w2_bf = w2.astype(jnp.bfloat16)

    # Eval-mode forward (Dropout is identity in eval()).
    y = jax.block_until_ready(feed_forward(x, w1_bf, b1, w2_bf, b2, training=False))
    assert y.shape == (B, T, EMBD)

    # Reference using the same bf16-operand / f32-accumulate recipe.
    bf16_ep = _use_bf16_epilogue()
    ref = _reference_bf16(x, w1, b1, w2, b2, bf16_ep)
    assert jnp.allclose(y, ref, atol=1e-2, rtol=1e-2), "mismatch vs bf16 reference"

    # Loose sanity check against full-f32 math (the torch-module semantics).
    ref32 = (jnp.maximum(x.reshape(-1, EMBD) @ w1 + b1, 0.0) @ w2 + b2)
    ref32 = ref32.reshape(B, T, EMBD)
    assert jnp.allclose(y, ref32, atol=6e-2, rtol=6e-2), "mismatch vs f32 reference"

    # Training-mode forward: exercise the in-kernel hashed-dropout path.
    yt = jax.block_until_ready(
        feed_forward(x, w1_bf, b1, w2_bf, b2, training=True, seed=123))
    assert yt.shape == (B, T, EMBD)
    assert bool(jnp.all(jnp.isfinite(yt)))
    drop_frac = float(jnp.mean(yt == 0.0))
    assert 0.02 <= drop_frac <= 0.25, f"unexpected dropout fraction {drop_frac}"

    # TODO(synk): torch's dropout RNG stream is not reproduced (mask comes from
    # an in-kernel counter hash); statistical semantics of nn.Dropout(0.1) match.

    print("KERNEL_OK")
</pallas_src>

<mosaic_0001>
module attributes {stable_mosaic.version = 11 : i64} {
  func.func @_ffn_kernel(%arg0: i32, %arg1: memref<16x256xf32, #tpu.memory_space<vmem>>, %arg2: memref<256x1024xbf16, #tpu.memory_space<vmem>>, %arg3: memref<1x1024xf32, #tpu.memory_space<vmem>>, %arg4: memref<1024x256xbf16, #tpu.memory_space<vmem>>, %arg5: memref<1x256xf32, #tpu.memory_space<vmem>>, %arg6: memref<16x256xf32, #tpu.memory_space<vmem>>) attributes {dimension_semantics = [#tpu.dimension_semantics<parallel>], iteration_bounds = array<i64: 1>, scalar_prefetch = 0 : i64, scratch_operands = 0 : i64, tpu.core_type = #tpu.core_type<tc>, window_params = [{transform_indices = @transform_0, window_bounds = array<i64: 16, 256>}, {pipeline_mode = #tpu.pipeline_mode<synchronous>, transform_indices = @transform_1, window_bounds = array<i64: 256, 1024>}, {pipeline_mode = #tpu.pipeline_mode<synchronous>, transform_indices = @transform_2, window_bounds = array<i64: 1, 1024>}, {pipeline_mode = #tpu.pipeline_mode<synchronous>, transform_indices = @transform_3, window_bounds = array<i64: 1024, 256>}, {pipeline_mode = #tpu.pipeline_mode<synchronous>, transform_indices = @transform_4, window_bounds = array<i64: 1, 256>}, {transform_indices = @transform_5, window_bounds = array<i64: 16, 256>}]} {
    %c0 = arith.constant 0 : index
    %c0_0 = arith.constant 0 : index
    %0 = vector.load %arg1[%c0, %c0_0] : memref<16x256xf32, #tpu.memory_space<vmem>>, vector<16x256xf32>
    %1 = arith.truncf %0 : vector<16x256xf32> to vector<16x256xbf16>
    %c0_1 = arith.constant 0 : index
    %c0_2 = arith.constant 0 : index
    %2 = vector.load %arg2[%c0_1, %c0_2] : memref<256x1024xbf16, #tpu.memory_space<vmem>>, vector<256x1024xbf16>
    %cst = arith.constant dense<0.000000e+00> : vector<16x1024xf32>
    %3 = tpu.matmul %1, %2, %cst {dimension_numbers = #tpu.dot_dimension_numbers<[1], [0], [0], [1], [0, 0, 1, 1], [], []>} : vector<16x256xbf16>, vector<256x1024xbf16>, vector<16x1024xf32> -> vector<16x1024xf32>
    %4 = arith.truncf %3 : vector<16x1024xf32> to vector<16x1024xbf16>
    %c0_3 = arith.constant 0 : index
    %c0_4 = arith.constant 0 : index
    %5 = vector.load %arg3[%c0_3, %c0_4] : memref<1x1024xf32, #tpu.memory_space<vmem>>, vector<1x1024xf32>
    %6 = arith.truncf %5 : vector<1x1024xf32> to vector<1x1024xbf16>
    %7 = vector.broadcast %6 : vector<1x1024xbf16> to vector<16x1024xbf16>
    %8 = arith.addf %4, %7 : vector<16x1024xbf16>
    %cst_5 = arith.constant 0.000000e+00 : bf16
    %9 = vector.broadcast %cst_5 : bf16 to vector<16x1024xbf16>
    %10 = arith.maximumf %8, %9 : vector<16x1024xbf16>
    %c0_6 = arith.constant 0 : index
    %c0_7 = arith.constant 0 : index
    %11 = vector.load %arg4[%c0_6, %c0_7] : memref<1024x256xbf16, #tpu.memory_space<vmem>>, vector<1024x256xbf16>
    %cst_8 = arith.constant dense<0.000000e+00> : vector<16x256xf32>
    %12 = tpu.matmul %10, %11, %cst_8 {dimension_numbers = #tpu.dot_dimension_numbers<[1], [0], [0], [1], [0, 0, 1, 1], [], []>} : vector<16x1024xbf16>, vector<1024x256xbf16>, vector<16x256xf32> -> vector<16x256xf32>
    %c0_9 = arith.constant 0 : index
    %c0_10 = arith.constant 0 : index
    %13 = vector.load %arg5[%c0_9, %c0_10] : memref<1x256xf32, #tpu.memory_space<vmem>>, vector<1x256xf32>
    %14 = vector.broadcast %13 : vector<1x256xf32> to vector<16x256xf32>
    %15 = arith.addf %12, %14 : vector<16x256xf32>
    %c0_11 = arith.constant 0 : index
    %c0_12 = arith.constant 0 : index
    %16 = vector.load %arg6[%c0_11, %c0_12] : memref<16x256xf32, #tpu.memory_space<vmem>>, vector<16x256xf32>
    tpu.vector_store %arg6[%c0_11, %c0_12], %15 {strides = array<i32>} : memref<16x256xf32, #tpu.memory_space<vmem>>, vector<16x256xf32>,
    return
  }
  func.func @transform_0(%arg0: i32) -> (i32, i32) {
    %c0_i32 = arith.constant 0 : i32
    %c0_i32_0 = arith.constant 0 : i32
    return %arg0, %c0_i32 : i32, i32
  }
  func.func @transform_1(%arg0: i32) -> (i32, i32) {
    %c0_i32 = arith.constant 0 : i32
    %c0_i32_0 = arith.constant 0 : i32
    %c0_i32_1 = arith.constant 0 : i32
    return %c0_i32, %c0_i32_0 : i32, i32
  }
  func.func @transform_2(%arg0: i32) -> (i32, i32) {
    %c0_i32 = arith.constant 0 : i32
    %c0_i32_0 = arith.constant 0 : i32
    %c0_i32_1 = arith.constant 0 : i32
    return %c0_i32, %c0_i32_0 : i32, i32
  }
  func.func @transform_3(%arg0: i32) -> (i32, i32) {
    %c0_i32 = arith.constant 0 : i32
    %c0_i32_0 = arith.constant 0 : i32
    %c0_i32_1 = arith.constant 0 : i32
    return %c0_i32, %c0_i32_0 : i32, i32
  }
  func.func @transform_4(%arg0: i32) -> (i32, i32) {
    %c0_i32 = arith.constant 0 : i32
    %c0_i32_0 = arith.constant 0 : i32
    %c0_i32_1 = arith.constant 0 : i32
    return %c0_i32, %c0_i32_0 : i32, i32
  }
  func.func @transform_5(%arg0: i32) -> (i32, i32) {
    %c0_i32 = arith.constant 0 : i32
    %c0_i32_0 = arith.constant 0 : i32
    return %arg0, %c0_i32 : i32, i32
  }
}

</mosaic_0001>

<bundles_post_ra>
// kernel: tpu_custom_call.1
= control target key start
LH: loop header
LB: loop body
LE: loop exit
PB: predicated region body
PF: predicated region fallthrough
CT: control target
= control target key end

     0   :  { %10 = vsyncpa [#allocation3], 0  ;;  %s2816_s0 = inlined_call_operand.hbm [shape: f32[16,256], index: 0, kind: input, shape index: {}]   ;;  %s2817_s1 = inlined_call_operand.hbm [shape: bf16[256,1024], index: 1, kind: input, shape index: {}]   ;;  %s2818_s2 = inlined_call_operand.hbm [shape: f32[1,1024], index: 2, kind: input, shape index: {}]   ;;  %s2819_s3 = inlined_call_operand.hbm [shape: bf16[1024,256], index: 3, kind: input, shape index: {}]   ;;  %s2820_s4 = inlined_call_operand.vmem [shape: f32[1,256], index: 4, kind: input, shape index: {}]   ;;  %s2821_s5 = inlined_call_operand.hbm [shape: f32[16,256], index: 5, kind: output, shape index: {}]  }
   0x1   :  { %11 = vsyncpa [#allocation6], 0 }
   0x2   :  { %12 = vsyncpa [#allocation9], 0 }
   0x3   :  { %13 = vsyncpa [#allocation4], 0  ;;  %s2694_s18 = smov [#allocation5]  }
   0x4   :  { %s31_s19 = sshll.u32 %s2694_s18, 4  ;;  %s32_s19 = int_to_ptr.vmem [resolvable:$true] %s31_s19 }
   0x5   :  { %s2594_s20 = scalar_lea.vmem %s32_s19, 16384  ;;  %p2599_p1 = scmp.lt.s32.totalorder %s32_s19, %s32_s19 }
   0x6   :  { %p2595_p0 = scmp.ne.s32.totalorder %s32_s19, %s2594_s20  ;;  %p2600_p2 = scmp.lt.s32.totalorder %s2594_s20, %s2594_s20 }
   0x8   :  { %p2601_p3 = por %p2600_p2, %p2599_p1 }
   0xa   :  { %p2602_p4 = pnand %p2601_p3, %p2595_p0 }
   0xc   :  { %2605 = shalt.err (!%p2602_p4)
}
   0xd   :  { %s2695_s21 = smov 512   ;;  %s2696_s22 = smov 32  }
   0xe   :  { %37 = dma.hbm_to_vmem [thread:$0]  %s2817_s1, 16384, %s32_s19, [#allocation6], %s2695_s21, %s2695_s21, %s2696_s22  }
   0xf   :  { %s2697_s25 = smov [#allocation2]  }
  0x10   :  { %s19_s26 = sshll.u32 %s2697_s25, 4  ;;  %s20_s26 = int_to_ptr.vmem [resolvable:$true] %s19_s26 }
  0x11   :  { %s2614_s27 = scalar_lea.vmem %s20_s26, 512  ;;  %p2619_p6 = scmp.lt.s32.totalorder %s20_s26, %s20_s26 }
  0x12   :  { %p2615_p5 = scmp.ne.s32.totalorder %s20_s26, %s2614_s27  ;;  %p2620_p7 = scmp.lt.s32.totalorder %s2614_s27, %s2614_s27 }
  0x14   :  { %p2621_p8 = por %p2620_p7, %p2619_p6 }
  0x16   :  { %p2622_p9 = pnand %p2621_p8, %p2615_p5 }
  0x18   :  { %2625 = shalt.err (!%p2622_p9)
}
  0x19   :  { %s2698_s28 = smov 256   ;;  %s2699_s29 = smov 16  }
  0x1a   :  { %25 = dma.hbm_to_vmem [thread:$0]  %s2816_s0, 512, %s20_s26, [#allocation3], %s2698_s28, %s2698_s28, %s2699_s29  }
  0x1b   :  { %s2700_s1 = smov [#allocation7]   ;;  %s2701_s8 = smov [#allocation8]  }
  0x1c   :  { %s44_s7 = sshll.u32 %s2700_s1, 4  ;;  %s53_s9 = sshll.u32 %s2701_s8, 4  ;;  %s45_s7 = int_to_ptr.vmem [resolvable:$true] %s44_s7  ;;  %s54_s9 = int_to_ptr.vmem [resolvable:$true] %s53_s9 }
  0x1d   :  { %s2634_s10 = scalar_lea.vmem %s45_s7, 128  ;;  %p2639_p11 = scmp.lt.s32.totalorder %s45_s7, %s45_s7 }
  0x1e   :  { %p2635_p10 = scmp.ne.s32.totalorder %s45_s7, %s2634_s10  ;;  %p2640_p12 = scmp.lt.s32.totalorder %s2634_s10, %s2634_s10 }
  0x20   :  { %p2641_p13 = por %p2640_p12, %p2639_p11 }
  0x22   :  { %p2642_p0 = pnand %p2641_p13, %p2635_p10 }
  0x24   :  { %2645 = shalt.err (!%p2642_p0)
}
  0x25   :  { %47 = dma.hbm_to_vmem [thread:$0]  %s2818_s2, 128, %s45_s7, [#allocation6]  }
  0x26   :  { %s2654_s13 = scalar_lea.vmem %s54_s9, 16384  ;;  %p2659_p2 = scmp.lt.s32.totalorder %s54_s9, %s54_s9 }
  0x27   :  { %p2655_p1 = scmp.ne.s32.totalorder %s54_s9, %s2654_s13  ;;  %p2660_p3 = scmp.lt.s32.totalorder %s2654_s13, %s2654_s13 }
  0x29   :  { %p2661_p4 = por %p2660_p3, %p2659_p2 }
  0x2b   :  { %p2662_p5 = pnand %p2661_p4, %p2655_p1 }
  0x2d   :  { %2665 = shalt.err (!%p2662_p5)
}
  0x2e   :  { %s2702_s0 = smov 128   ;;  %s2703_s14 = smov 8  }
  0x2f   :  { %59 = dma.hbm_to_vmem [thread:$0]  %s2819_s3, 16384, %s54_s9, [#allocation9], %s2702_s0, %s2702_s0, %s2703_s14  }
  0x30   :  { %2686 = dma.done.wait [#allocation3], 512  }
  0x31   :  { %2687 = vsyncadd [#allocation3], 4294966784 }
  0x32   :  { %2688 = dma.done.wait [#allocation6], 16512  }
  0x33   :  { %2689 = vsyncadd [#allocation6], 4294950784 }
  0x34   :  { %2690 = dma.done.wait [#allocation9], 16384  }
  0x35   :  { %2691 = vsyncadd [#allocation9], 4294950912  ;;  %v137_v0 = vld [vmem:[#allocation5 + $0x1c0] sm:$0xff]  ;;  %v138_v2 = vld [vmem:[#allocation5 + $0x1c8] sm:$0xff] }
  0x36   :  { %v141_v1 = vld [vmem:[#allocation5 + $0x1e0] sm:$0xff]  ;;  %v142_v4 = vld [vmem:[#allocation5 + $0x1e8] sm:$0xff]  ;;  %v78_v54 = vld [vmem:[#allocation2 + $0x18] sm:$0xff] }
  0x37   :  { %v2183_v3 = vcombine.high %v137_v0, %v141_v1  ;;  %v2182_v5 = vcombine.low %v137_v0, %v141_v1  ;;  %v129_v6 = vld [vmem:[#allocation5 + $0x180] sm:$0xff]  ;;  %v2185_v8 = vcombine.high %v138_v2, %v142_v4  ;;  %v2184_v9 = vcombine.low %v138_v2, %v142_v4  ;;  %v130_v11 = vld [vmem:[#allocation5 + $0x188] sm:$0xff] }
  0x38   :  { %v133_v7 = vld [vmem:[#allocation5 + $0x1a0] sm:$0xff]  ;;  %v134_v12 = vld [vmem:[#allocation5 + $0x1a8] sm:$0xff] }
  0x39   :  { %v2175_v10 = vcombine.high %v129_v6, %v133_v7  ;;  %v121_v13 = vld [vmem:[#allocation5 + $0x140] sm:$0xff]  ;;  %849 = vmatprep.subr.bf16.mxu0 %v2183_v3  ;;  %v2177_v14 = vcombine.high %v130_v11, %v134_v12  ;;  %v122_v16 = vld [vmem:[#allocation5 + $0x148] sm:$0xff]  ;;  %892 = vmatprep.subr.bf16.mxu1 %v2185_v8  ;;  %v2174_v18 = vcombine.low %v129_v6, %v133_v7 }
  0x3a   :  { %v125_v15 = vld [vmem:[#allocation5 + $0x160] sm:$0xff]  ;;  %v126_v17 = vld [vmem:[#allocation5 + $0x168] sm:$0xff]  ;;  %850 = vmatpush1.bf16.msra.mxu0 %v2182_v5  ;;  %893 = vmatpush1.bf16.msra.mxu1 %v2184_v9  ;;  %v2176_v19 = vcombine.low %v130_v11, %v134_v12 }
  0x3b   :  { %851 = vmatprep.subr.bf16.mxu0 %v2175_v10  ;;  %v2167_v20 = vcombine.high %v121_v13, %v125_v15  ;;  %894 = vmatprep.subr.bf16.mxu1 %v2177_v14  ;;  %v2169_v21 = vcombine.high %v122_v16, %v126_v17  ;;  %v113_v22 = vld [vmem:[#allocation5 + $0x100] sm:$0xff]  ;;  %v114_v24 = vld [vmem:[#allocation5 + $0x108] sm:$0xff]  ;;  %v2166_v26 = vcombine.low %v121_v13, %v125_v15 }
  0x3c   :  { %v117_v23 = vld [vmem:[#allocation5 + $0x120] sm:$0xff]  ;;  %v118_v25 = vld [vmem:[#allocation5 + $0x128] sm:$0xff]  ;;  %v2168_v27 = vcombine.low %v122_v16, %v126_v17 }
  0x3d   :  { %v2159_v28 = vcombine.high %v113_v22, %v117_v23  ;;  %v2161_v29 = vcombine.high %v114_v24, %v118_v25  ;;  %v105_v30 = vld [vmem:[#allocation5 + $0xc0] sm:$0xff]  ;;  %v106_v32 = vld [vmem:[#allocation5 + $0xc8] sm:$0xff]  ;;  %v2158_v34 = vcombine.low %v113_v22, %v117_v23  ;;  %v2160_v35 = vcombine.low %v114_v24, %v118_v25 }
  0x3e   :  { %852 = vmatpush1.bf16.msra.mxu0 %v2174_v18  ;;  %895 = vmatpush1.bf16.msra.mxu1 %v2176_v19  ;;  %v109_v31 = vld [vmem:[#allocation5 + $0xe0] sm:$0xff]  ;;  %v110_v33 = vld [vmem:[#allocation5 + $0xe8] sm:$0xff] }
  0x3f   :  { %853 = vmatprep.subr.bf16.mxu0 %v2167_v20  ;;  %896 = vmatprep.subr.bf16.mxu1 %v2169_v21  ;;  %v2151_v36 = vcombine.high %v105_v30, %v109_v31  ;;  %v2153_v37 = vcombine.high %v106_v32, %v110_v33  ;;  %v97_v38 = vld [vmem:[#allocation5 + $0x80] sm:$0xff]  ;;  %v98_v40 = vld [vmem:[#allocation5 + $0x88] sm:$0xff]  ;;  %v2150_v42 = vcombine.low %v105_v30, %v109_v31 }
  0x40   :  { %v101_v39 = vld [vmem:[#allocation5 + $0xa0] sm:$0xff]  ;;  %v102_v41 = vld [vmem:[#allocation5 + $0xa8] sm:$0xff]  ;;  %v2152_v43 = vcombine.low %v106_v32, %v110_v33 }
  0x41   :  { %v2143_v44 = vcombine.high %v97_v38, %v101_v39  ;;  %v2145_v45 = vcombine.high %v98_v40, %v102_v41  ;;  %v89_v46 = vld [vmem:[#allocation5 + $0x40] sm:$0xff]  ;;  %v90_v48 = vld [vmem:[#allocation5 + $0x48] sm:$0xff]  ;;  %v2142_v50 = vcombine.low %v97_v38, %v101_v39  ;;  %v2144_v51 = vcombine.low %v98_v40, %v102_v41 }
  0x42   :  { %854 = vmatpush1.bf16.msra.mxu0 %v2166_v26  ;;  %897 = vmatpush1.bf16.msra.mxu1 %v2168_v27  ;;  %v93_v47 = vld [vmem:[#allocation5 + $0x60] sm:$0xff]  ;;  %v94_v49 = vld [vmem:[#allocation5 + $0x68] sm:$0xff] }
  0x43   :  { %855 = vmatprep.subr.bf16.mxu0 %v2159_v28  ;;  %898 = vmatprep.subr.bf16.mxu1 %v2161_v29  ;;  %v2135_v52 = vcombine.high %v89_v46, %v93_v47  ;;  %v76_v53 = vld [vmem:[#allocation2 + $0x8] sm:$0xff]  ;;  %v2137_v55 = vcombine.high %v90_v48, %v94_v49  ;;  %v81_v56 = vld [vmem:[#allocation5] sm:$0xff]  ;;  %v2134_v61 = vcombine.low %v89_v46, %v93_v47 }
  0x44   :  { %v85_v57 = vld [vmem:[#allocation5 + $0x20] sm:$0xff]  ;;  %v2751_v58 = vpack.c.bf16 %v78_v54, %v76_v53  ;;  %v82_v59 = vld [vmem:[#allocation5 + $0x8] sm:$0xff]  ;;  %v2136_v62 = vcombine.low %v90_v48, %v94_v49 }
  0x45   :  { %v86_v60 = vld [vmem:[#allocation5 + $0x28] sm:$0xff]  ;;  %v2127_v63 = vcombine.high %v81_v56, %v85_v57  ;;  %v201_v1 = vld [vmem:[#allocation5 + $0x3c0] sm:$0xff]  ;;  %v2126_v5 = vcombine.low %v81_v56, %v85_v57 }
  0x46   :  { %856 = vmatpush1.bf16.msra.mxu0 %v2158_v34  ;;  %899 = vmatpush1.bf16.msra.mxu1 %v2160_v35  ;;  %v2129_v0 = vcombine.high %v82_v59, %v86_v60  ;;  %v205_v2 = vld [vmem:[#allocation5 + $0x3e0] sm:$0xff]  ;;  %v202_v3 = vld [vmem:[#allocation5 + $0x3c8] sm:$0xff]  ;;  %v2128_v6 = vcombine.low %v82_v59, %v86_v60 }
  0x47   :  { %857 = vmatprep.subr.bf16.mxu0 %v2151_v36  ;;  %900 = vmatprep.subr.bf16.mxu1 %v2153_v37  ;;  %v206_v4 = vld [vmem:[#allocation5 + $0x3e8] sm:$0xff]  ;;  %v2247_v7 = vcombine.high %v201_v1, %v205_v2  ;;  %v193_v9 = vld [vmem:[#allocation5 + $0x380] sm:$0xff]  ;;  %v2246_v13 = vcombine.low %v201_v1, %v205_v2 }
  0x48   :  { %881 = vmatprep.mubr.bf16.mxu0 %v2751_v58  ;;  %924 = vmatprep.mubr.bf16.mxu1 %v2751_v58  ;;  %v2249_v8 = vcombine.high %v202_v3, %v206_v4  ;;  %v197_v10 = vld [vmem:[#allocation5 + $0x3a0] sm:$0xff]  ;;  %v194_v11 = vld [vmem:[#allocation5 + $0x388] sm:$0xff]  ;;  %v2248_v14 = vcombine.low %v202_v3, %v206_v4  ;;  %v139_v3 = vld [vmem:[#allocation5 + $0x1d0] sm:$0xff] }
  0x49   :  { %v198_v12 = vld [vmem:[#allocation5 + $0x3a8] sm:$0xff]  ;;  %v2239_v15 = vcombine.high %v193_v9, %v197_v10  ;;  %v185_v17 = vld [vmem:[#allocation5 + $0x340] sm:$0xff]  ;;  %v2238_v21 = vcombine.low %v193_v9, %v197_v10  ;;  %v143_v4 = vld [vmem:[#allocation5 + $0x1f0] sm:$0xff] }
  0x4a   :  { %858 = vmatpush1.bf16.msra.mxu0 %v2150_v42  ;;  %901 = vmatpush1.bf16.msra.mxu1 %v2152_v43  ;;  %v2241_v16 = vcombine.high %v194_v11, %v198_v12  ;;  %v189_v18 = vld [vmem:[#allocation5 + $0x360] sm:$0xff]  ;;  %v186_v19 = vld [vmem:[#allocation5 + $0x348] sm:$0xff]  ;;  %v2240_v22 = vcombine.low %v194_v11, %v198_v12  ;;  %v2187_v10 = vcombine.high %v139_v3, %v143_v4  ;;  %v131_v12 = vld [vmem:[#allocation5 + $0x190] sm:$0xff] }
  0x4b   :  { %859 = vmatprep.subr.bf16.mxu0 %v2143_v44  ;;  %902 = vmatprep.subr.bf16.mxu1 %v2145_v45  ;;  %v190_v20 = vld [vmem:[#allocation5 + $0x368] sm:$0xff]  ;;  %v2231_v23 = vcombine.high %v185_v17, %v189_v18  ;;  %v177_v25 = vld [vmem:[#allocation5 + $0x300] sm:$0xff]  ;;  %v2230_v29 = vcombine.low %v185_v17, %v189_v18  ;;  %v2186_v17 = vcombine.low %v139_v3, %v143_v4  ;;  %v207_v3 = vld [vmem:[#allocation5 + $0x3f0] sm:$0xff] }
  0x4c   :  { %v2233_v24 = vcombine.high %v186_v19, %v190_v20  ;;  %v181_v26 = vld [vmem:[#allocation5 + $0x320] sm:$0xff]  ;;  %v178_v27 = vld [vmem:[#allocation5 + $0x308] sm:$0xff]  ;;  %v2232_v30 = vcombine.low %v186_v19, %v190_v20 }
  0x4d   :  { %v182_v28 = vld [vmem:[#allocation5 + $0x328] sm:$0xff]  ;;  %v2223_v31 = vcombine.high %v177_v25, %v181_v26  ;;  %v169_v33 = vld [vmem:[#allocation5 + $0x2c0] sm:$0xff]  ;;  %v2222_v37 = vcombine.low %v177_v25, %v181_v26 }
  0x4e   :  { %860 = vmatpush1.bf16.msra.mxu0 %v2142_v50  ;;  %903 = vmatpush1.bf16.msra.mxu1 %v2144_v51  ;;  %v2225_v32 = vcombine.high %v178_v27, %v182_v28  ;;  %v173_v34 = vld [vmem:[#allocation5 + $0x2e0] sm:$0xff]  ;;  %v170_v35 = vld [vmem:[#allocation5 + $0x2c8] sm:$0xff]  ;;  %v2224_v38 = vcombine.low %v178_v27, %v182_v28 }
  0x4f   :  { %861 = vmatprep.subr.bf16.mxu0 %v2135_v52  ;;  %904 = vmatprep.subr.bf16.mxu1 %v2137_v55  ;;  %v174_v36 = vld [vmem:[#allocation5 + $0x2e8] sm:$0xff]  ;;  %v2215_v39 = vcombine.high %v169_v33, %v173_v34  ;;  %v161_v41 = vld [vmem:[#allocation5 + $0x280] sm:$0xff]  ;;  %v2214_v45 = vcombine.low %v169_v33, %v173_v34 }
  0x50   :  { %v2217_v40 = vcombine.high %v170_v35, %v174_v36  ;;  %v165_v42 = vld [vmem:[#allocation5 + $0x2a0] sm:$0xff]  ;;  %v162_v43 = vld [vmem:[#allocation5 + $0x288] sm:$0xff]  ;;  %v2216_v46 = vcombine.low %v170_v35, %v174_v36 }
  0x51   :  { %v166_v44 = vld [vmem:[#allocation5 + $0x2a8] sm:$0xff]  ;;  %v2207_v47 = vcombine.high %v161_v41, %v165_v42  ;;  %v153_v49 = vld [vmem:[#allocation5 + $0x240] sm:$0xff]  ;;  %v2206_v53 = vcombine.low %v161_v41, %v165_v42  ;;  %v99_v42 = vld [vmem:[#allocation5 + $0x90] sm:$0xff] }
  0x52   :  { %862 = vmatpush1.bf16.msra.mxu0 %v2134_v61  ;;  %905 = vmatpush1.bf16.msra.mxu1 %v2136_v62  ;;  %v2209_v48 = vcombine.high %v162_v43, %v166_v44  ;;  %v157_v50 = vld [vmem:[#allocation5 + $0x260] sm:$0xff]  ;;  %v154_v51 = vld [vmem:[#allocation5 + $0x248] sm:$0xff]  ;;  %v2208_v54 = vcombine.low %v162_v43, %v166_v44 }
  0x53   :  { %863 = vmatprep.subr.bf16.mxu0 %v2127_v63  ;;  %906 = vmatprep.subr.bf16.mxu1 %v2129_v0  ;;  %v158_v52 = vld [vmem:[#allocation5 + $0x268] sm:$0xff]  ;;  %v2199_v55 = vcombine.high %v153_v49, %v157_v50  ;;  %v145_v57 = vld [vmem:[#allocation5 + $0x200] sm:$0xff]  ;;  %v2198_v62 = vcombine.low %v153_v49, %v157_v50  ;;  %v91_v49 = vld [vmem:[#allocation5 + $0x50] sm:$0xff] }
  0x54   :  { %v2201_v56 = vcombine.high %v154_v51, %v158_v52  ;;  %v149_v59 = vld [vmem:[#allocation5 + $0x220] sm:$0xff]  ;;  %v146_v60 = vld [vmem:[#allocation5 + $0x208] sm:$0xff]  ;;  %v2200_v63 = vcombine.low %v154_v51, %v158_v52  ;;  %v95_v50 = vld [vmem:[#allocation5 + $0x70] sm:$0xff] }
  0x55   :  { %v150_v61 = vld [vmem:[#allocation5 + $0x228] sm:$0xff]  ;;  %v2191_v0 = vcombine.high %v145_v57, %v149_v59  ;;  %v75_v2 = vld [vmem:[#allocation2] sm:$0xff] }
  0x56   :  { %864 = vmatpush1.bf16.msra.mxu0 %v2126_v5  ;;  %907 = vmatpush1.bf16.msra.mxu1 %v2128_v6  ;;  %v2193_v1 = vcombine.high %v146_v60, %v150_v61  ;;  %v140_v5 = vld [vmem:[#allocation5 + $0x1d8] sm:$0xff]  ;;  %v2192_v9 = vcombine.low %v146_v60, %v150_v61  ;;  %v2139_v61 = vcombine.high %v91_v49, %v95_v50 }
  0x57   :  { %865 = vmatprep.subr.bf16.mxu0 %v2247_v7  ;;  %908 = vmatprep.subr.bf16.mxu1 %v2249_v8  ;;  %v144_v6 = vld [vmem:[#allocation5 + $0x1f8] sm:$0xff]  ;;  %v2190_v7 = vcombine.low %v145_v57, %v149_v59  ;;  %v77_v8 = vld [vmem:[#allocation2 + $0x10] sm:$0xff] }
  0x58   :  { %v2189_v11 = vcombine.high %v140_v5, %v144_v6  ;;  %v2188_v18 = vcombine.low %v140_v5, %v144_v6  ;;  %v83_v57 = vld [vmem:[#allocation5 + $0x10] sm:$0xff]  ;;  %v204_v6 = vld [vmem:[#allocation5 + $0x3d8] sm:$0xff] }
  0x59   :  { %v87_v59 = vld [vmem:[#allocation5 + $0x30] sm:$0xff] }
  0x5a   :  { %866 = vmatpush2.bf16.msra.mxu0 %v2246_v13  ;;  %909 = vmatpush2.bf16.msra.mxu1 %v2248_v14  ;;  %v135_v13 = vld [vmem:[#allocation5 + $0x1b0] sm:$0xff]  ;;  %v2755_v14 = vpack.c.bf16 %v77_v8, %v75_v2  ;;  %v2131_v5 = vcombine.high %v83_v57, %v87_v59 }
  0x5b   :  { %867 = vmatprep.subr.bf16.mxu0 %v2239_v15  ;;  %910 = vmatprep.subr.bf16.mxu1 %v2241_v16  ;;  %v132_v15 = vld [vmem:[#allocation5 + $0x198] sm:$0xff]  ;;  %v2179_v19 = vcombine.high %v131_v12, %v135_v13  ;;  %v2178_v25 = vcombine.low %v131_v12, %v135_v13  ;;  %v203_v2 = vld [vmem:[#allocation5 + $0x3d0] sm:$0xff] }
  0x5c   :  { %v136_v16 = vld [vmem:[#allocation5 + $0x1b8] sm:$0xff]  ;;  %v2251_v13 = vcombine.high %v203_v2, %v207_v3 }
  0x5d   :  { %v2181_v20 = vcombine.high %v132_v15, %v136_v16  ;;  %v2180_v26 = vcombine.low %v132_v15, %v136_v16  ;;  %v196_v15 = vld [vmem:[#allocation5 + $0x398] sm:$0xff] }
  0x5e   :  { %868 = vmatpush2.bf16.msra.mxu0 %v2238_v21  ;;  %911 = vmatpush2.bf16.msra.mxu1 %v2240_v22  ;;  %v123_v21 = vld [vmem:[#allocation5 + $0x150] sm:$0xff]  ;;  %v200_v16 = vld [vmem:[#allocation5 + $0x3b8] sm:$0xff] }
  0x5f   :  { %869 = vmatprep.subr.bf16.mxu0 %v2231_v23  ;;  %912 = vmatprep.subr.bf16.mxu1 %v2233_v24  ;;  %v127_v22 = vld [vmem:[#allocation5 + $0x170] sm:$0xff]  ;;  %v124_v23 = vld [vmem:[#allocation5 + $0x158] sm:$0xff] }
  0x60   :  { %v128_v24 = vld [vmem:[#allocation5 + $0x178] sm:$0xff]  ;;  %v2171_v27 = vcombine.high %v123_v21, %v127_v22  ;;  %v2170_v33 = vcombine.low %v123_v21, %v127_v22 }
  0x61   :  { %v2173_v28 = vcombine.high %v124_v23, %v128_v24  ;;  %v2172_v34 = vcombine.low %v124_v23, %v128_v24  ;;  %v188_v23 = vld [vmem:[#allocation5 + $0x358] sm:$0xff] }
  0x62   :  { %870 = vmatpush2.bf16.msra.mxu0 %v2230_v29  ;;  %913 = vmatpush2.bf16.msra.mxu1 %v2232_v30  ;;  %v115_v29 = vld [vmem:[#allocation5 + $0x110] sm:$0xff]  ;;  %v192_v24 = vld [vmem:[#allocation5 + $0x378] sm:$0xff] }
  0x63   :  { %871 = vmatprep.subr.bf16.mxu0 %v2223_v31  ;;  %914 = vmatprep.subr.bf16.mxu1 %v2225_v32  ;;  %v119_v30 = vld [vmem:[#allocation5 + $0x130] sm:$0xff]  ;;  %v116_v31 = vld [vmem:[#allocation5 + $0x118] sm:$0xff] }
  0x64   :  { %v120_v32 = vld [vmem:[#allocation5 + $0x138] sm:$0xff]  ;;  %v2163_v35 = vcombine.high %v115_v29, %v119_v30  ;;  %v2162_v41 = vcombine.low %v115_v29, %v119_v30  ;;  %v2244_v29 = vcombine.low %v196_v15, %v200_v16 }
  0x65   :  { %v2165_v36 = vcombine.high %v116_v31, %v120_v32  ;;  %v2164_v43 = vcombine.low %v116_v31, %v120_v32  ;;  %v180_v31 = vld [vmem:[#allocation5 + $0x318] sm:$0xff] }
  0x66   :  { %872 = vmatpush2.bf16.msra.mxu0 %v2222_v37  ;;  %915 = vmatpush2.bf16.msra.mxu1 %v2224_v38  ;;  %v107_v37 = vld [vmem:[#allocation5 + $0xd0] sm:$0xff]  ;;  %v184_v32 = vld [vmem:[#allocation5 + $0x338] sm:$0xff] }
  0x67   :  { %873 = vmatprep.subr.bf16.mxu0 %v2215_v39  ;;  %916 = vmatprep.subr.bf16.mxu1 %v2217_v40  ;;  %v111_v38 = vld [vmem:[#allocation5 + $0xf0] sm:$0xff]  ;;  %v108_v39 = vld [vmem:[#allocation5 + $0xd8] sm:$0xff] }
  0x68   :  { %v112_v40 = vld [vmem:[#allocation5 + $0xf8] sm:$0xff]  ;;  %v2155_v44 = vcombine.high %v107_v37, %v111_v38 }
  0x69   :  { %v2156_v51 = vcombine.low %v108_v39, %v112_v40 }
  0x6a   :  { %874 = vmatpush2.bf16.msra.mxu0 %v2214_v45  ;;  %917 = vmatpush2.bf16.msra.mxu1 %v2216_v46  ;;  %v2157_v45 = vcombine.high %v108_v39, %v112_v40  ;;  %v100_v46 = vld [vmem:[#allocation5 + $0x98] sm:$0xff]  ;;  %v175_v39 = vld [vmem:[#allocation5 + $0x2f0] sm:$0xff] }
  0x6b   :  { %875 = vmatprep.subr.bf16.mxu0 %v2207_v47  ;;  %918 = vmatprep.subr.bf16.mxu1 %v2209_v48  ;;  %v104_v47 = vld [vmem:[#allocation5 + $0xb8] sm:$0xff]  ;;  %v2154_v48 = vcombine.low %v107_v37, %v111_v38  ;;  %v2229_v37 = vcombine.high %v180_v31, %v184_v32  ;;  %v171_v38 = vld [vmem:[#allocation5 + $0x2d0] sm:$0xff] }
  0x6c   :  { %v2148_v60 = vcombine.low %v100_v46, %v104_v47  ;;  %v172_v40 = vld [vmem:[#allocation5 + $0x2d8] sm:$0xff] }
  0x6e   :  { %876 = vmatpush2.bf16.msra.mxu0 %v2206_v53  ;;  %919 = vmatpush2.bf16.msra.mxu1 %v2208_v54  ;;  %v92_v53 = vld [vmem:[#allocation5 + $0x58] sm:$0xff] }
  0x6f   :  { %877 = vmatprep.subr.bf16.mxu0 %v2199_v55  ;;  %920 = vmatprep.subr.bf16.mxu1 %v2201_v56  ;;  %v96_v54 = vld [vmem:[#allocation5 + $0x78] sm:$0xff]  ;;  %v2149_v55 = vcombine.high %v100_v46, %v104_v47  ;;  %v167_v46 = vld [vmem:[#allocation5 + $0x2b0] sm:$0xff] }
  0x70   :  { %v2140_v4 = vcombine.low %v92_v53, %v96_v54  ;;  %v164_v47 = vld [vmem:[#allocation5 + $0x298] sm:$0xff] }
  0x72   :  { %878 = vmatpush2.bf16.msra.mxu0 %v2198_v62  ;;  %921 = vmatpush2.bf16.msra.mxu1 %v2200_v63  ;;  %v84_v62 = vld [vmem:[#allocation5 + $0x18] sm:$0xff] }
  0x73   :  { %879 = vmatprep.subr.bf16.mxu0 %v2191_v0  ;;  %922 = vmatprep.subr.bf16.mxu1 %v2193_v1  ;;  %v88_v63 = vld [vmem:[#allocation5 + $0x38] sm:$0xff]  ;;  %v2141_v0 = vcombine.high %v92_v53, %v96_v54  ;;  %v2138_v1 = vcombine.low %v91_v49, %v95_v50  ;;  %v2218_v49 = vcombine.low %v171_v38, %v175_v39  ;;  %v155_v53 = vld [vmem:[#allocation5 + $0x250] sm:$0xff] }
  0x74   :  { %v2133_v8 = vcombine.high %v84_v62, %v88_v63  ;;  %v2132_v12 = vcombine.low %v84_v62, %v88_v63  ;;  %v159_v54 = vld [vmem:[#allocation5 + $0x270] sm:$0xff] }
  0x75   :  { %v147_v62 = vld [vmem:[#allocation5 + $0x210] sm:$0xff] }
  0x76   :  { %880 = vmatpush2.bf16.msra.mxu0 %v2190_v7  ;;  %923 = vmatpush2.bf16.msra.mxu1 %v2192_v9  ;;  %v208_v7 = vld [vmem:[#allocation5 + $0x3f8] sm:$0xff]  ;;  %v2130_v9 = vcombine.low %v83_v57, %v87_v59  ;;  %v151_v63 = vld [vmem:[#allocation5 + $0x230] sm:$0xff] }
  0x77   :  { %935 = vmatprep.subr.bf16.mxu0 %v2187_v10  ;;  %978 = vmatprep.subr.bf16.mxu1 %v2189_v11  ;;  %v195_v10 = vld [vmem:[#allocation5 + $0x390] sm:$0xff]  ;;  %v2252_v21 = vcombine.low %v204_v6, %v208_v7 }
  0x78   :  { %v199_v11 = vld [vmem:[#allocation5 + $0x3b0] sm:$0xff] }
  0x79   :  { %882 = vmatmul.mubr.bf16.vlgmr.msra.gmra.mxu0 %v2755_v14  ;;  %925 = vmatmul.mubr.bf16.vlgmr.msra.gmra.mxu1 %v2755_v14  ;;  %v2243_v22 = vcombine.high %v195_v10, %v199_v11 }
  0x7a   :  { %936 = vmatpush1.bf16.msra.mxu0 %v2186_v17  ;;  %979 = vmatpush1.bf16.msra.mxu1 %v2188_v18  ;;  %v2253_v17 = vcombine.high %v204_v6, %v208_v7  ;;  %v2250_v18 = vcombine.low %v203_v2, %v207_v3  ;;  %v2202_v2 = vcombine.low %v155_v53, %v159_v54 }
  0x7b   :  { %937 = vmatprep.subr.bf16.mxu0 %v2179_v19  ;;  %980 = vmatprep.subr.bf16.mxu1 %v2181_v20  ;;  %v187_v19 = vld [vmem:[#allocation5 + $0x350] sm:$0xff]  ;;  %v2194_v6 = vcombine.low %v147_v62, %v151_v63 }
  0x7c   :  { %967 = vmatprep.mubr.bf16.mxu0 %v2751_v58  ;;  %1010 = vmatprep.mubr.bf16.mxu1 %v2751_v58  ;;  %v103_v58 = vld [vmem:[#allocation5 + $0xb0] sm:$0xff] }
  0x7d   :  { %v2147_v52 = vcombine.high %v99_v42, %v103_v58  ;;  %v2146_v56 = vcombine.low %v99_v42, %v103_v58  ;;  %v191_v20 = vld [vmem:[#allocation5 + $0x370] sm:$0xff] }
  0x7e   :  { %938 = vmatpush1.bf16.msra.mxu0 %v2178_v25  ;;  %981 = vmatpush1.bf16.msra.mxu1 %v2180_v26  ;;  %v2245_v25 = vcombine.high %v196_v15, %v200_v16  ;;  %v2242_v26 = vcombine.low %v195_v10, %v199_v11  ;;  %v2235_v30 = vcombine.high %v187_v19, %v191_v20  ;;  %v2394_v10 = vld [vmem:[#allocation8 + $0x70] ss:$8 sps:$4 sm:$0xff]   ;;  %v2400_v15 = vld [vmem:[#allocation8 + $0x60] ss:$8 sps:$4 sm:$0xff]  }
  0x7f   :  { %939 = vmatprep.subr.bf16.mxu0 %v2171_v27  ;;  %982 = vmatprep.subr.bf16.mxu1 %v2173_v28  ;;  %v179_v27 = vld [vmem:[#allocation5 + $0x310] sm:$0xff]  ;;  %v2397_v11 = vld [vmem:[#allocation8 + $0x170] ss:$8 sps:$4 sm:$0xff]  }
  0x80   :  { %v183_v28 = vld [vmem:[#allocation5 + $0x330] sm:$0xff] }
  0x81   :  { %v2226_v42 = vcombine.low %v179_v27, %v183_v28  ;;  %v2403_v16 = vld [vmem:[#allocation8 + $0x160] ss:$8 sps:$4 sm:$0xff]  }
  0x82   :  { %940 = vmatpush1.bf16.msra.mxu0 %v2170_v33  ;;  %983 = vmatpush1.bf16.msra.mxu1 %v2172_v34  ;;  %v2237_v33 = vcombine.high %v188_v23, %v192_v24  ;;  %v2234_v34 = vcombine.low %v187_v19, %v191_v20  ;;  %v2406_v19 = vld [vmem:[#allocation8 + $0x50] ss:$8 sps:$4 sm:$0xff]  }
  0x83   :  { %941 = vmatprep.subr.bf16.mxu0 %v2163_v35  ;;  %984 = vmatprep.subr.bf16.mxu1 %v2165_v36  ;;  %v2236_v35 = vcombine.low %v188_v23, %v192_v24  ;;  %v2227_v36 = vcombine.high %v179_v27, %v183_v28  ;;  %v2409_v20 = vld [vmem:[#allocation8 + $0x150] ss:$8 sps:$4 sm:$0xff]   ;;  %v2412_v23 = vld [vmem:[#allocation8 + $0x40] ss:$8 sps:$4 sm:$0xff]   ;;  %v2420_v24 = vld [vmem:[#allocation8 + $0x34] ss:$8 sps:$4 sm:$0xff]  }
  0x84   :  { %v2421_v27 = vld [vmem:[#allocation8 + $0x130] ss:$8 sps:$4 sm:$0xff]   ;;  %v2426_v28 = vld [vmem:[#allocation8 + $0x24] ss:$8 sps:$4 sm:$0xff]  }
  0x86   :  { %942 = vmatpush1.bf16.msra.mxu0 %v2162_v41  ;;  %985 = vmatpush1.bf16.msra.mxu1 %v2164_v43  ;;  %v176_v41 = vld [vmem:[#allocation5 + $0x2f8] sm:$0xff]  ;;  %v2228_v43 = vcombine.low %v180_v31, %v184_v32  ;;  %v2427_v31 = vld [vmem:[#allocation8 + $0x120] ss:$8 sps:$4 sm:$0xff]  }
  0x87   :  { %943 = vmatprep.subr.bf16.mxu0 %v2155_v44  ;;  %986 = vmatprep.subr.bf16.mxu1 %v2157_v45  ;;  %v2219_v44 = vcombine.high %v171_v38, %v175_v39  ;;  %v2221_v58 = vcombine.high %v172_v40, %v176_v41  ;;  %v163_v45 = vld [vmem:[#allocation5 + $0x290] sm:$0xff]  ;;  %v2220_v50 = vcombine.low %v172_v40, %v176_v41  ;;  %v2432_v32 = vld [vmem:[#allocation8 + $0x14] ss:$8 sps:$4 sm:$0xff]  }
  0x88   :  { %v2210_v57 = vcombine.low %v163_v45, %v167_v46  ;;  %v2436_v38 = vld [vmem:[#allocation8] ss:$8 sps:$4 sm:$0xff]   ;;  %v2444_v40 = vld [vmem:[#allocation8 + $0xf4] ss:$8 sps:$4 sm:$0xff]  }
  0x89   :  { %v2439_v39 = vld [vmem:[#allocation8 + $0x100] ss:$8 sps:$4 sm:$0xff]   ;;  %v2447_v41 = vld [vmem:[#allocation8 + $0x1f4] ss:$8 sps:$4 sm:$0xff]  }
  0x8a   :  { %944 = vmatpush1.bf16.msra.mxu0 %v2154_v48  ;;  %987 = vmatpush1.bf16.msra.mxu1 %v2156_v51  ;;  %v168_v48 = vld [vmem:[#allocation5 + $0x2b8] sm:$0xff]  ;;  %v2211_v51 = vcombine.high %v163_v45, %v167_v46  ;;  %v2448_v45 = vld [vmem:[#allocation8 + $0xe0] ss:$8 sps:$4 sm:$0xff]  }
  0x8b   :  { %945 = vmatprep.subr.bf16.mxu0 %v2147_v52  ;;  %988 = vmatprep.subr.bf16.mxu1 %v2149_v55  ;;  %v2213_v52 = vcombine.high %v164_v47, %v168_v48  ;;  %v156_v55 = vld [vmem:[#allocation5 + $0x258] sm:$0xff]  ;;  %v2212_v59 = vcombine.low %v164_v47, %v168_v48  ;;  %v2451_v46 = vld [vmem:[#allocation8 + $0x1e0] ss:$8 sps:$4 sm:$0xff]  }
  0x8c   :  { %v2456_v47 = vld [vmem:[#allocation8 + $0xd4] ss:$8 sps:$4 sm:$0xff]  }
  0x8d   :  { %v2459_v48 = vld [vmem:[#allocation8 + $0x1d4] ss:$8 sps:$4 sm:$0xff]  }
  0x8e   :  { %946 = vmatpush1.bf16.msra.mxu0 %v2146_v56  ;;  %989 = vmatpush1.bf16.msra.mxu1 %v2148_v60  ;;  %v160_v56 = vld [vmem:[#allocation5 + $0x278] sm:$0xff]  ;;  %v2203_v60 = vcombine.high %v155_v53, %v159_v54  ;;  %v2460_v53 = vld [vmem:[#allocation8 + $0xc0] ss:$8 sps:$4 sm:$0xff]  }
  0x8f   :  { %947 = vmatprep.subr.bf16.mxu0 %v2139_v61  ;;  %990 = vmatprep.subr.bf16.mxu1 %v2141_v0  ;;  %v2205_v61 = vcombine.high %v156_v55, %v160_v56  ;;  %v148_v0 = vld [vmem:[#allocation5 + $0x218] sm:$0xff]  ;;  %v2204_v3 = vcombine.low %v156_v55, %v160_v56  ;;  %v2463_v54 = vld [vmem:[#allocation8 + $0x1c0] ss:$8 sps:$4 sm:$0xff]  }
  0x90   :  { %v2468_v55 = vld [vmem:[#allocation8 + $0xb4] ss:$8 sps:$4 sm:$0xff]  }
  0x91   :  { %v2471_v56 = vld [vmem:[#allocation8 + $0x1b4] ss:$8 sps:$4 sm:$0xff]  }
  0x92   :  { %948 = vmatpush1.bf16.msra.mxu0 %v2138_v1  ;;  %991 = vmatpush1.bf16.msra.mxu1 %v2140_v4  ;;  %v152_v1 = vld [vmem:[#allocation5 + $0x238] sm:$0xff]  ;;  %v2195_v4 = vcombine.high %v147_v62, %v151_v63  ;;  %v2472_v62 = vld [vmem:[#allocation8 + $0xa0] ss:$8 sps:$4 sm:$0xff]  }
  0x93   :  { %949 = vmatprep.subr.bf16.mxu0 %v2131_v5  ;;  %992 = vmatprep.subr.bf16.mxu1 %v2133_v8  ;;  %v2197_v5 = vcombine.high %v148_v0, %v152_v1  ;;  %v2196_v7 = vcombine.low %v148_v0, %v152_v1  ;;  %v2396_v8 = vld [vmem:[#allocation8 + $0x74] ss:$8 sps:$4 sm:$0xff]   ;;  %v2475_v63 = vld [vmem:[#allocation8 + $0x1a0] ss:$8 sps:$4 sm:$0xff]  }
  0x94   :  { %v2480_v0 = vld [vmem:[#allocation8 + $0x94] ss:$8 sps:$4 sm:$0xff]  }
  0x95   :  { %v2483_v1 = vld [vmem:[#allocation8 + $0x194] ss:$8 sps:$4 sm:$0xff]  }
  0x96   :  { %950 = vmatpush1.bf16.msra.mxu0 %v2130_v9  ;;  %993 = vmatpush1.bf16.msra.mxu1 %v2132_v12  ;;  %v2399_v9 = vld [vmem:[#allocation8 + $0x174] ss:$8 sps:$4 sm:$0xff]   ;;  %v2402_v12 = vld [vmem:[#allocation8 + $0x64] ss:$8 sps:$4 sm:$0xff]  }
  0x97   :  { %951 = vmatprep.subr.bf16.mxu0 %v2251_v13  ;;  %994 = vmatprep.subr.bf16.mxu1 %v2253_v17  ;;  %v2405_v13 = vld [vmem:[#allocation8 + $0x164] ss:$8 sps:$4 sm:$0xff]   ;;  %v2408_v17 = vld [vmem:[#allocation8 + $0x54] ss:$8 sps:$4 sm:$0xff]  }
  0x9a   :  { %952 = vmatpush2.bf16.msra.mxu0 %v2250_v18  ;;  %995 = vmatpush2.bf16.msra.mxu1 %v2252_v21  ;;  %v2411_v18 = vld [vmem:[#allocation8 + $0x154] ss:$8 sps:$4 sm:$0xff]   ;;  %v2414_v21 = vld [vmem:[#allocation8 + $0x44] ss:$8 sps:$4 sm:$0xff]  }
  0x9b   :  { %953 = vmatprep.subr.bf16.mxu0 %v2243_v22  ;;  %996 = vmatprep.subr.bf16.mxu1 %v2245_v25  ;;  %v2417_v22 = vld [vmem:[#allocation8 + $0x144] ss:$8 sps:$4 sm:$0xff]   ;;  %v2423_v25 = vld [vmem:[#allocation8 + $0x134] ss:$8 sps:$4 sm:$0xff]  }
  0x9e   :  { %954 = vmatpush2.bf16.msra.mxu0 %v2242_v26  ;;  %997 = vmatpush2.bf16.msra.mxu1 %v2244_v29  ;;  %v2418_v26 = vld [vmem:[#allocation8 + $0x30] ss:$8 sps:$4 sm:$0xff]   ;;  %v2429_v29 = vld [vmem:[#allocation8 + $0x124] ss:$8 sps:$4 sm:$0xff]  }
  0x9f   :  { %955 = vmatprep.subr.bf16.mxu0 %v2235_v30  ;;  %998 = vmatprep.subr.bf16.mxu1 %v2237_v33  ;;  %v2424_v30 = vld [vmem:[#allocation8 + $0x20] ss:$8 sps:$4 sm:$0xff]   ;;  %v2435_v33 = vld [vmem:[#allocation8 + $0x114] ss:$8 sps:$4 sm:$0xff]  }
  0xa2   :  { %956 = vmatpush2.bf16.msra.mxu0 %v2234_v34  ;;  %999 = vmatpush2.bf16.msra.mxu1 %v2236_v35  ;;  %v2430_v34 = vld [vmem:[#allocation8 + $0x10] ss:$8 sps:$4 sm:$0xff]  }
  0xa3   :  { %957 = vmatprep.subr.bf16.mxu0 %v2227_v36  ;;  %1000 = vmatprep.subr.bf16.mxu1 %v2229_v37  ;;  %v2433_v35 = vld [vmem:[#allocation8 + $0x110] ss:$8 sps:$4 sm:$0xff]   ;;  %v2438_v36 = vld [vmem:[#allocation8 + $0x4] ss:$8 sps:$4 sm:$0xff]  }
  0xa4   :  { %v2441_v37 = vld [vmem:[#allocation8 + $0x104] ss:$8 sps:$4 sm:$0xff]  }
  0xa6   :  { %958 = vmatpush2.bf16.msra.mxu0 %v2226_v42  ;;  %1001 = vmatpush2.bf16.msra.mxu1 %v2228_v43  ;;  %v2442_v42 = vld [vmem:[#allocation8 + $0xf0] ss:$8 sps:$4 sm:$0xff]  }
  0xa7   :  { %959 = vmatprep.subr.bf16.mxu0 %v2219_v44  ;;  %1002 = vmatprep.subr.bf16.mxu1 %v2221_v58  ;;  %v2445_v43 = vld [vmem:[#allocation8 + $0x1f0] ss:$8 sps:$4 sm:$0xff]   ;;  %v2450_v44 = vld [vmem:[#allocation8 + $0xe4] ss:$8 sps:$4 sm:$0xff]  }
  0xa8   :  { %v2453_v58 = vld [vmem:[#allocation8 + $0x1e4] ss:$8 sps:$4 sm:$0xff]  }
  0xaa   :  { %960 = vmatpush2.bf16.msra.mxu0 %v2218_v49  ;;  %1003 = vmatpush2.bf16.msra.mxu1 %v2220_v50  ;;  %v2454_v49 = vld [vmem:[#allocation8 + $0xd0] ss:$8 sps:$4 sm:$0xff]  }
  0xab   :  { %961 = vmatprep.subr.bf16.mxu0 %v2211_v51  ;;  %1004 = vmatprep.subr.bf16.mxu1 %v2213_v52  ;;  %v2457_v50 = vld [vmem:[#allocation8 + $0x1d0] ss:$8 sps:$4 sm:$0xff]   ;;  %v2462_v51 = vld [vmem:[#allocation8 + $0xc4] ss:$8 sps:$4 sm:$0xff]  }
  0xac   :  { %v2465_v52 = vld [vmem:[#allocation8 + $0x1c4] ss:$8 sps:$4 sm:$0xff]  }
  0xae   :  { %962 = vmatpush2.bf16.msra.mxu0 %v2210_v57  ;;  %1005 = vmatpush2.bf16.msra.mxu1 %v2212_v59  ;;  %v2466_v57 = vld [vmem:[#allocation8 + $0xb0] ss:$8 sps:$4 sm:$0xff]  }
  0xaf   :  { %963 = vmatprep.subr.bf16.mxu0 %v2203_v60  ;;  %1006 = vmatprep.subr.bf16.mxu1 %v2205_v61  ;;  %v2469_v59 = vld [vmem:[#allocation8 + $0x1b0] ss:$8 sps:$4 sm:$0xff]   ;;  %v2474_v60 = vld [vmem:[#allocation8 + $0xa4] ss:$8 sps:$4 sm:$0xff]  }
  0xb0   :  { %v2477_v61 = vld [vmem:[#allocation8 + $0x1a4] ss:$8 sps:$4 sm:$0xff]  }
  0xb2   :  { %964 = vmatpush2.bf16.msra.mxu0 %v2202_v2  ;;  %1007 = vmatpush2.bf16.msra.mxu1 %v2204_v3  ;;  %v2478_v2 = vld [vmem:[#allocation8 + $0x90] ss:$8 sps:$4 sm:$0xff]  }
  0xb3   :  { %965 = vmatprep.subr.bf16.mxu0 %v2195_v4  ;;  %1008 = vmatprep.subr.bf16.mxu1 %v2197_v5  ;;  %v2481_v3 = vld [vmem:[#allocation8 + $0x190] ss:$8 sps:$4 sm:$0xff]   ;;  %v2486_v4 = vld [vmem:[#allocation8 + $0x84] ss:$8 sps:$4 sm:$0xff]  }
  0xb4   :  { %v2489_v5 = vld [vmem:[#allocation8 + $0x184] ss:$8 sps:$4 sm:$0xff]  }
  0xb6   :  { %966 = vmatpush2.bf16.msra.mxu0 %v2194_v6  ;;  %1009 = vmatpush2.bf16.msra.mxu1 %v2196_v7  ;;  %v2484_v6 = vld [vmem:[#allocation8 + $0x80] ss:$8 sps:$4 sm:$0xff]  }
  0xb7   :  { %1931 = vmatprep.subr.bf16.mxu0 %v2396_v8  ;;  %1974 = vmatprep.subr.bf16.mxu1 %v2399_v9  ;;  %v2487_v7 = vld [vmem:[#allocation8 + $0x180] ss:$8 sps:$4 sm:$0xff]   ;;  %v2492_v8 = vld [vmem:[#allocation8 + $0x274] ss:$8 sps:$4 sm:$0xff]  }
  0xb8   :  { %v2495_v9 = vld [vmem:[#allocation8 + $0x374] ss:$8 sps:$4 sm:$0xff]  }
  0xb9   :  { %968 = vmatmul.mubr.bf16.vlgmr.msra.gmra.mxu0 %v2755_v14  ;;  %1011 = vmatmul.mubr.bf16.vlgmr.msra.gmra.mxu1 %v2755_v14  ;;  %v2415_v14 = vld [vmem:[#allocation8 + $0x140] ss:$8 sps:$4 sm:$0xff]  }
  0xba   :  { %1932 = vmatpush1.bf16.msra.mxu0 %v2394_v10  ;;  %1975 = vmatpush1.bf16.msra.mxu1 %v2397_v11  ;;  %v1031_v10 = vlaneseq }
  0xbb   :  { %1933 = vmatprep.subr.bf16.mxu0 %v2402_v12  ;;  %1976 = vmatprep.subr.bf16.mxu1 %v2405_v13  ;;  %v2768_v13 = vld [vmem:[#allocation7] sm:$0xff] }
  0xbc   :  { %v2763_v11 = vshrl.u32 %v1031_v10, 7  ;;  %v2520_v10 = vld [vmem:[#allocation8 + $0x220] ss:$8 sps:$4 sm:$0xff]  }
  0xbe   :  { %1934 = vmatpush1.bf16.msra.mxu0 %v2400_v15  ;;  %1977 = vmatpush1.bf16.msra.mxu1 %v2403_v16  ;;  %v2766_v12 = vsub.s32 0, %v2763_v11  ;;  %v1041_v15 = vsub.s32 2, %v2763_v11  ;;  %v1037_v16 = vsub.s32 1, %v2763_v11 }
  0xbf   :  { %1935 = vmatprep.subr.bf16.mxu0 %v2408_v17  ;;  %1978 = vmatprep.subr.bf16.mxu1 %v2411_v18  ;;  %v1045_v17 = vsub.s32 3, %v2763_v11 }
  0xc0   :  { %v1034_v18 = vrot.slane %v2768_v13, %v2766_v12 }
  0xc2   :  { %1936 = vmatpush1.bf16.msra.mxu0 %v2406_v19  ;;  %1979 = vmatpush1.bf16.msra.mxu1 %v2409_v20  ;;  %v1042_v19 = vrot.slane %v2768_v13, %v1041_v15  ;;  %v1038_v20 = vrot.slane %v2768_v13, %v1037_v16  ;;  %v2523_v15 = vld [vmem:[#allocation8 + $0x320] ss:$8 sps:$4 sm:$0xff]  }
  0xc3   :  { %1937 = vmatprep.subr.bf16.mxu0 %v2414_v21  ;;  %1980 = vmatprep.subr.bf16.mxu1 %v2417_v22  ;;  %v1046_v21 = vrot.slane %v2768_v13, %v1045_v17  ;;  %v1071_v22 = vpack.c.bf16 %v1034_v18, %v1034_v18  ;;  %v2528_v17 = vld [vmem:[#allocation8 + $0x214] ss:$8 sps:$4 sm:$0xff]  }
  0xc4   :  { %v2531_v18 = vld [vmem:[#allocation8 + $0x314] ss:$8 sps:$4 sm:$0xff]  }
  0xc6   :  { %1938 = vmatpush1.bf16.msra.mxu0 %v2412_v23  ;;  %1981 = vmatpush1.bf16.msra.mxu1 %v2415_v14  ;;  %v1073_v23 = vpack.c.bf16 %v1042_v19, %v1042_v19  ;;  %v1072_v14 = vpack.c.bf16 %v1038_v20, %v1038_v20  ;;  %v2526_v19 = vld [vmem:[#allocation8 + $0x210] ss:$8 sps:$4 sm:$0xff]  }
  0xc7   :  { %1939 = vmatprep.subr.bf16.mxu0 %v2420_v24  ;;  %1982 = vmatprep.subr.bf16.mxu1 %v2423_v25  ;;  %v1074_v24 = vpack.c.bf16 %v1046_v21, %v1046_v21  ;;  %v2529_v20 = vld [vmem:[#allocation8 + $0x310] ss:$8 sps:$4 sm:$0xff]   ;;  %v2534_v21 = vld [vmem:[#allocation8 + $0x204] ss:$8 sps:$4 sm:$0xff]  }
  0xca   :  { %1940 = vmatpush1.bf16.msra.mxu0 %v2418_v26  ;;  %1983 = vmatpush1.bf16.msra.mxu1 %v2421_v27  ;;  %v1080_v26 = vpack.i.b16 %v1071_v22, %v1071_v22  ;;  %v2537_v22 = vld [vmem:[#allocation8 + $0x304] ss:$8 sps:$4 sm:$0xff]  }
  0xcb   :  { %1941 = vmatprep.subr.bf16.mxu0 %v2426_v28  ;;  %1984 = vmatprep.subr.bf16.mxu1 %v2429_v29  ;;  %v1094_v28 = vpack.i.b16 %v1073_v23, %v1073_v23  ;;  %v1087_v29 = vpack.i.b16 %v1072_v14, %v1072_v14  ;;  %v2532_v23 = vld [vmem:[#allocation8 + $0x200] ss:$8 sps:$4 sm:$0xff]  }
  0xcc   :  { %v2535_v14 = vld [vmem:[#allocation8 + $0x300] ss:$8 sps:$4 sm:$0xff]  }
  0xce   :  { %1942 = vmatpush1.bf16.msra.mxu0 %v2424_v30  ;;  %1985 = vmatpush1.bf16.msra.mxu1 %v2427_v31  ;;  %v1101_v31 = vpack.i.b16 %v1074_v24, %v1074_v24  ;;  %v2540_v24 = vld [vmem:[#allocation8 + $0x2f4] ss:$8 sps:$4 sm:$0xff]  }
  0xcf   :  { %1943 = vmatprep.subr.bf16.mxu0 %v2432_v32  ;;  %1986 = vmatprep.subr.bf16.mxu1 %v2435_v33 }
  0xd2   :  { %1944 = vmatpush1.bf16.msra.mxu0 %v2430_v34  ;;  %1987 = vmatpush1.bf16.msra.mxu1 %v2433_v35  ;;  %v1085_v34 = vrot.slane %v1080_v26, %v2766_v12  ;;  %v2538_v26 = vld [vmem:[#allocation8 + $0x2f0] ss:$8 sps:$4 sm:$0xff]  }
  0xd3   :  { %1945 = vmatprep.subr.bf16.mxu0 %v2438_v36  ;;  %1988 = vmatprep.subr.bf16.mxu1 %v2441_v37  ;;  %v1099_v37 = vrot.slane %v1094_v28, %v2766_v12  ;;  %v2546_v28 = vld [vmem:[#allocation8 + $0x2e4] ss:$8 sps:$4 sm:$0xff]  }
  0xd6   :  { %1946 = vmatpush1.bf16.msra.mxu0 %v2436_v38  ;;  %1989 = vmatpush1.bf16.msra.mxu1 %v2439_v39  ;;  %v1092_v38 = vrot.slane %v1087_v29, %v2766_v12  ;;  %v2549_v29 = vld [vmem:[#allocation8 + $0x3e4] ss:$8 sps:$4 sm:$0xff]  }
  0xd7   :  { %1947 = vmatprep.subr.bf16.mxu0 %v2444_v40  ;;  %1990 = vmatprep.subr.bf16.mxu1 %v2447_v41  ;;  %v1106_v41 = vrot.slane %v1101_v31, %v2766_v12  ;;  %v2547_v31 = vld [vmem:[#allocation8 + $0x3e0] ss:$8 sps:$4 sm:$0xff]  }
  0xda   :  { %1948 = vmatpush2.bf16.msra.mxu0 %v2442_v42  ;;  %1991 = vmatpush2.bf16.msra.mxu1 %v2445_v43 }
  0xdb   :  { %1949 = vmatprep.subr.bf16.mxu0 %v2450_v44  ;;  %1992 = vmatprep.subr.bf16.mxu1 %v2453_v58 }
  0xde   :  { %1950 = vmatpush2.bf16.msra.mxu0 %v2448_v45  ;;  %1993 = vmatpush2.bf16.msra.mxu1 %v2451_v46 }
  0xdf   :  { %1951 = vmatprep.subr.bf16.mxu0 %v2456_v47  ;;  %1994 = vmatprep.subr.bf16.mxu1 %v2459_v48  ;;  %v2704_v48 = vmov 0  }
  0xe2   :  { %1952 = vmatpush2.bf16.msra.mxu0 %v2454_v49  ;;  %1995 = vmatpush2.bf16.msra.mxu1 %v2457_v50  ;;  %v2490_v50 = vld [vmem:[#allocation8 + $0x270] ss:$8 sps:$4 sm:$0xff]  }
  0xe3   :  { %1953 = vmatprep.subr.bf16.mxu0 %v2462_v51  ;;  %1996 = vmatprep.subr.bf16.mxu1 %v2465_v52 }
  0xe6   :  { %1954 = vmatpush2.bf16.msra.mxu0 %v2460_v53  ;;  %1997 = vmatpush2.bf16.msra.mxu1 %v2463_v54  ;;  %v2493_v53 = vld [vmem:[#allocation8 + $0x370] ss:$8 sps:$4 sm:$0xff]   ;;  %v2498_v54 = vld [vmem:[#allocation8 + $0x264] ss:$8 sps:$4 sm:$0xff]  }
  0xe7   :  { %1955 = vmatprep.subr.bf16.mxu0 %v2468_v55  ;;  %1998 = vmatprep.subr.bf16.mxu1 %v2471_v56  ;;  %v2501_v56 = vld [vmem:[#allocation8 + $0x364] ss:$8 sps:$4 sm:$0xff]  }
  0xea   :  { %1956 = vmatpush2.bf16.msra.mxu0 %v2466_v57  ;;  %1999 = vmatpush2.bf16.msra.mxu1 %v2469_v59  ;;  %v2496_v57 = vld [vmem:[#allocation8 + $0x260] ss:$8 sps:$4 sm:$0xff]  }
  0xeb   :  { %1957 = vmatprep.subr.bf16.mxu0 %v2474_v60  ;;  %2000 = vmatprep.subr.bf16.mxu1 %v2477_v61  ;;  %v2499_v59 = vld [vmem:[#allocation8 + $0x360] ss:$8 sps:$4 sm:$0xff]   ;;  %v2504_v60 = vld [vmem:[#allocation8 + $0x254] ss:$8 sps:$4 sm:$0xff]  }
  0xec   :  { %v2507_v61 = vld [vmem:[#allocation8 + $0x354] ss:$8 sps:$4 sm:$0xff]  }
  0xee   :  { %1958 = vmatpush2.bf16.msra.mxu0 %v2472_v62  ;;  %2001 = vmatpush2.bf16.msra.mxu1 %v2475_v63  ;;  %v2502_v62 = vld [vmem:[#allocation8 + $0x250] ss:$8 sps:$4 sm:$0xff]  }
  0xef   :  { %1959 = vmatprep.subr.bf16.mxu0 %v2480_v0  ;;  %2002 = vmatprep.subr.bf16.mxu1 %v2483_v1  ;;  %v2505_v63 = vld [vmem:[#allocation8 + $0x350] ss:$8 sps:$4 sm:$0xff]   ;;  %v2510_v0 = vld [vmem:[#allocation8 + $0x244] ss:$8 sps:$4 sm:$0xff]  }
  0xf0   :  { %v2513_v1 = vld [vmem:[#allocation8 + $0x344] ss:$8 sps:$4 sm:$0xff]  }
  0xf2   :  { %1960 = vmatpush2.bf16.msra.mxu0 %v2478_v2  ;;  %2003 = vmatpush2.bf16.msra.mxu1 %v2481_v3  ;;  %v2508_v2 = vld [vmem:[#allocation8 + $0x240] ss:$8 sps:$4 sm:$0xff]  }
  0xf3   :  { %1961 = vmatprep.subr.bf16.mxu0 %v2486_v4  ;;  %2004 = vmatprep.subr.bf16.mxu1 %v2489_v5  ;;  %v2511_v3 = vld [vmem:[#allocation8 + $0x340] ss:$8 sps:$4 sm:$0xff]   ;;  %v2516_v4 = vld [vmem:[#allocation8 + $0x234] ss:$8 sps:$4 sm:$0xff]  }
  0xf4   :  { %v2519_v5 = vld [vmem:[#allocation8 + $0x334] ss:$8 sps:$4 sm:$0xff]  }
  0xf6   :  { %1962 = vmatpush2.bf16.msra.mxu0 %v2484_v6  ;;  %2005 = vmatpush2.bf16.msra.mxu1 %v2487_v7  ;;  %v2514_v6 = vld [vmem:[#allocation8 + $0x230] ss:$8 sps:$4 sm:$0xff]  }
  0xf7   :  { %2017 = vmatprep.subr.bf16.mxu0 %v2492_v8  ;;  %2060 = vmatprep.subr.bf16.mxu1 %v2495_v9  ;;  %v2517_v7 = vld [vmem:[#allocation8 + $0x330] ss:$8 sps:$4 sm:$0xff]   ;;  %v2522_v8 = vld [vmem:[#allocation8 + $0x224] ss:$8 sps:$4 sm:$0xff]  }
  0xf8   :  { %v2525_v9 = vld [vmem:[#allocation8 + $0x324] ss:$8 sps:$4 sm:$0xff]  }
 0x139   :  { %v883_v25 = vpop.f32.mrf.mxu0  ;;  %v926_v27 = vpop.f32.mrf.mxu1 }
 0x13b   :  { %v885_v30 = vpop.f32.mrf.mxu0  ;;  %v928_v32 = vpop.f32.mrf.mxu1 }
 0x13d   :  { %v887_v33 = vpop.f32.mrf.mxu0  ;;  %v930_v36 = vpop.f32.mrf.mxu1 }
 0x13e   :  { %v1021_v35 = vpack.c.bf16 %v887_v33, %v883_v25  ;;  %v1023_v39 = vpack.c.bf16 %v930_v36, %v926_v27  ;;  %v2543_v25 = vld [vmem:[#allocation8 + $0x3f4] ss:$8 sps:$4 sm:$0xff]   ;;  %v2541_v27 = vld [vmem:[#allocation8 + $0x3f0] ss:$8 sps:$4 sm:$0xff]   ;;  %v2558_v36 = vld [vmem:[#allocation8 + $0x2c4] ss:$8 sps:$4 sm:$0xff]  }
 0x13f   :  { %v889_v40 = vpop.f32.mrf.mxu0  ;;  %v932_v43 = vpop.f32.mrf.mxu1  ;;  %v2555_v33 = vld [vmem:[#allocation8 + $0x3d4] ss:$8 sps:$4 sm:$0xff]  }
 0x140   :  { %v1022_v42 = vpack.c.bf16 %v889_v40, %v885_v30  ;;  %v1135_v44 = vadd.bf16 %v1085_v34, %v1021_v35  ;;  %v1024_v58 = vpack.c.bf16 %v932_v43, %v928_v32  ;;  %v1137_v45 = vadd.bf16 %v1099_v37, %v1023_v39  ;;  %v2544_v30 = vld [vmem:[#allocation8 + $0x2e0] ss:$8 sps:$4 sm:$0xff]   ;;  %v2552_v32 = vld [vmem:[#allocation8 + $0x2d4] ss:$8 sps:$4 sm:$0xff]   ;;  %v2550_v34 = vld [vmem:[#allocation8 + $0x2d0] ss:$8 sps:$4 sm:$0xff]  }
 0x141   :  { %v2553_v35 = vld [vmem:[#allocation8 + $0x3d0] ss:$8 sps:$4 sm:$0xff]   ;;  %v1049_v37 = vsub.s32 4, %v2763_v11  ;;  %v1057_v39 = vsub.s32 6, %v2763_v11  ;;  %v1053_v40 = vsub.s32 5, %v2763_v11 }
 0x142   :  { %v1136_v46 = vadd.bf16 %v1092_v38, %v1022_v42  ;;  %v1138_v47 = vadd.bf16 %v1106_v41, %v1024_v58  ;;  %v1143_v51 = vmax.bf16 %v2704_v48, %v1135_v44  ;;  %v1145_v55 = vmax.bf16 %v2704_v48, %v1137_v45  ;;  %v2561_v38 = vld [vmem:[#allocation8 + $0x3c4] ss:$8 sps:$4 sm:$0xff]   ;;  %v2556_v42 = vld [vmem:[#allocation8 + $0x2c0] ss:$8 sps:$4 sm:$0xff]   ;;  %v2564_v44 = vld [vmem:[#allocation8 + $0x2b4] ss:$8 sps:$4 sm:$0xff]  }
 0x143   :  { %v1061_v41 = vsub.s32 7, %v2763_v11  ;;  %v2559_v43 = vld [vmem:[#allocation8 + $0x3c0] ss:$8 sps:$4 sm:$0xff]   ;;  %v1050_v58 = vrot.slane %v2768_v13, %v1049_v37  ;;  %v2567_v45 = vld [vmem:[#allocation8 + $0x3b4] ss:$8 sps:$4 sm:$0xff]  }
 0x144   :  { %v1144_v49 = vmax.bf16 %v2704_v48, %v1136_v46  ;;  %v1146_v52 = vmax.bf16 %v2704_v48, %v1138_v47  ;;  %v1058_v46 = vrot.slane %v2768_v13, %v1057_v39  ;;  %v1054_v47 = vrot.slane %v2768_v13, %v1053_v40 }
 0x146   :  { %1963 = vmatprep.mubr.bf16.mxu0 %v1144_v49  ;;  %2006 = vmatprep.mubr.bf16.mxu1 %v1146_v52  ;;  %v1062_v49 = vrot.slane %v2768_v13, %v1061_v41  ;;  %v2570_v52 = vld [vmem:[#allocation8 + $0x2a4] ss:$8 sps:$4 sm:$0xff]   ;;  %v2576_v13 = vld [vmem:[#allocation8 + $0x294] ss:$8 sps:$4 sm:$0xff]  }
 0x147   :  { %1964 = vmatmul.mubr.bf16.vlgmr.msra.gmra.mxu0 %v1143_v51  ;;  %2007 = vmatmul.mubr.bf16.vlgmr.msra.gmra.mxu1 %v1145_v55  ;;  %v2565_v51 = vld [vmem:[#allocation8 + $0x3b0] ss:$8 sps:$4 sm:$0xff]   ;;  %v1077_v55 = vpack.c.bf16 %v1058_v46, %v1058_v46 }
 0x148   :  { %2018 = vmatpush1.bf16.msra.mxu0 %v2490_v50  ;;  %2061 = vmatpush1.bf16.msra.mxu1 %v2493_v53  ;;  %v2562_v50 = vld [vmem:[#allocation8 + $0x2b0] ss:$8 sps:$4 sm:$0xff]   ;;  %v1075_v53 = vpack.c.bf16 %v1050_v58, %v1050_v58 }
 0x149   :  { %2019 = vmatprep.subr.bf16.mxu0 %v2498_v54  ;;  %2062 = vmatprep.subr.bf16.mxu1 %v2501_v56  ;;  %v2573_v54 = vld [vmem:[#allocation8 + $0x3a4] ss:$8 sps:$4 sm:$0xff]   ;;  %v1076_v56 = vpack.c.bf16 %v1054_v47, %v1054_v47 }
 0x14c   :  { %2020 = vmatpush1.bf16.msra.mxu0 %v2496_v57  ;;  %2063 = vmatpush1.bf16.msra.mxu1 %v2499_v59  ;;  %v1078_v57 = vpack.c.bf16 %v1062_v49, %v1062_v49  ;;  %v2568_v59 = vld [vmem:[#allocation8 + $0x2a0] ss:$8 sps:$4 sm:$0xff]  }
 0x14d   :  { %2021 = vmatprep.subr.bf16.mxu0 %v2504_v60  ;;  %2064 = vmatprep.subr.bf16.mxu1 %v2507_v61  ;;  %v2571_v61 = vld [vmem:[#allocation8 + $0x3a0] ss:$8 sps:$4 sm:$0xff]  }
 0x150   :  { %2022 = vmatpush1.bf16.msra.mxu0 %v2502_v62  ;;  %2065 = vmatpush1.bf16.msra.mxu1 %v2505_v63  ;;  %v1108_v62 = vpack.i.b16 %v1075_v53, %v1075_v53 }
 0x151   :  { %2023 = vmatprep.subr.bf16.mxu0 %v2510_v0  ;;  %2066 = vmatprep.subr.bf16.mxu1 %v2513_v1  ;;  %v1122_v0 = vpack.i.b16 %v1077_v55, %v1077_v55  ;;  %v1115_v1 = vpack.i.b16 %v1076_v56, %v1076_v56 }
 0x154   :  { %2024 = vmatpush1.bf16.msra.mxu0 %v2508_v2  ;;  %2067 = vmatpush1.bf16.msra.mxu1 %v2511_v3  ;;  %v2579_v2 = vld [vmem:[#allocation8 + $0x394] ss:$8 sps:$4 sm:$0xff]  }
 0x155   :  { %2025 = vmatprep.subr.bf16.mxu0 %v2516_v4  ;;  %2068 = vmatprep.subr.bf16.mxu1 %v2519_v5  ;;  %v1129_v4 = vpack.i.b16 %v1078_v57, %v1078_v57 }
 0x158   :  { %2026 = vmatpush1.bf16.msra.mxu0 %v2514_v6  ;;  %2069 = vmatpush1.bf16.msra.mxu1 %v2517_v7  ;;  %v2574_v6 = vld [vmem:[#allocation8 + $0x290] ss:$8 sps:$4 sm:$0xff]  }
 0x159   :  { %2027 = vmatprep.subr.bf16.mxu0 %v2522_v8  ;;  %2070 = vmatprep.subr.bf16.mxu1 %v2525_v9  ;;  %v1113_v8 = vrot.slane %v1108_v62, %v2766_v12  ;;  %v2577_v9 = vld [vmem:[#allocation8 + $0x390] ss:$8 sps:$4 sm:$0xff]  }
 0x15c   :  { %2028 = vmatpush1.bf16.msra.mxu0 %v2520_v10  ;;  %2071 = vmatpush1.bf16.msra.mxu1 %v2523_v15  ;;  %v2582_v10 = vld [vmem:[#allocation8 + $0x284] ss:$8 sps:$4 sm:$0xff]  }
 0x15d   :  { %2029 = vmatprep.subr.bf16.mxu0 %v2528_v17  ;;  %2072 = vmatprep.subr.bf16.mxu1 %v2531_v18  ;;  %v1127_v18 = vrot.slane %v1122_v0, %v2766_v12 }
 0x160   :  { %2030 = vmatpush1.bf16.msra.mxu0 %v2526_v19  ;;  %2073 = vmatpush1.bf16.msra.mxu1 %v2529_v20  ;;  %v1120_v19 = vrot.slane %v1115_v1, %v2766_v12  ;;  %v2585_v20 = vld [vmem:[#allocation8 + $0x384] ss:$8 sps:$4 sm:$0xff]  }
 0x161   :  { %2031 = vmatprep.subr.bf16.mxu0 %v2534_v21  ;;  %2074 = vmatprep.subr.bf16.mxu1 %v2537_v22 }
 0x164   :  { %2032 = vmatpush1.bf16.msra.mxu0 %v2532_v23  ;;  %2075 = vmatpush1.bf16.msra.mxu1 %v2535_v14  ;;  %v1134_v23 = vrot.slane %v1129_v4, %v2766_v12 }
 0x165   :  { %2033 = vmatprep.subr.bf16.mxu0 %v2540_v24  ;;  %2076 = vmatprep.subr.bf16.mxu1 %v2543_v25  ;;  %v2580_v25 = vld [vmem:[#allocation8 + $0x280] ss:$8 sps:$4 sm:$0xff]  }
 0x168   :  { %2034 = vmatpush2.bf16.msra.mxu0 %v2538_v26  ;;  %2077 = vmatpush2.bf16.msra.mxu1 %v2541_v27 }
 0x169   :  { %2035 = vmatprep.subr.bf16.mxu0 %v2546_v28  ;;  %2078 = vmatprep.subr.bf16.mxu1 %v2549_v29  ;;  %v2583_v28 = vld [vmem:[#allocation8 + $0x380] ss:$8 sps:$4 sm:$0xff]  }
 0x16c   :  { %2036 = vmatpush2.bf16.msra.mxu0 %v2544_v30  ;;  %2079 = vmatpush2.bf16.msra.mxu1 %v2547_v31 }
 0x16d   :  { %2037 = vmatprep.subr.bf16.mxu0 %v2552_v32  ;;  %2080 = vmatprep.subr.bf16.mxu1 %v2555_v33 }
 0x170   :  { %2038 = vmatpush2.bf16.msra.mxu0 %v2550_v34  ;;  %2081 = vmatpush2.bf16.msra.mxu1 %v2553_v35 }
 0x171   :  { %2039 = vmatprep.subr.bf16.mxu0 %v2558_v36  ;;  %2082 = vmatprep.subr.bf16.mxu1 %v2561_v38  ;;  %v1279_v38 = vld [vmem:[%s2820_s4] sm:$0x3]  ;;  %s2705_s4 = smov [#allocation10]  }
 0x172   :  { %v1284_v40 = vrot.slane %v1279_v38, %v2766_v12  ;;  %s2112_s17 = sshll.u32 %s2705_s4, 4  ;;  %s2113_s17 = int_to_ptr.vmem [resolvable:$true] %s2112_s17 }
 0x173   :  { %s2666_s18 = scalar_lea.vmem %s2113_s17, 512  ;;  %p2671_p7 = scmp.lt.s32.totalorder %s2113_s17, %s2113_s17 }
 0x174   :  { %2040 = vmatpush2.bf16.msra.mxu0 %v2556_v42  ;;  %2083 = vmatpush2.bf16.msra.mxu1 %v2559_v43  ;;  %v1288_v42 = vrot.slane %v1279_v38, %v1037_v16  ;;  %p2667_p6 = scmp.ne.s32.totalorder %s2113_s17, %s2666_s18  ;;  %p2672_p8 = scmp.lt.s32.totalorder %s2666_s18, %s2666_s18 }
 0x175   :  { %2041 = vmatprep.subr.bf16.mxu0 %v2564_v44  ;;  %2084 = vmatprep.subr.bf16.mxu1 %v2567_v45 }
 0x176   :  { %p2673_p9 = por %p2672_p8, %p2671_p7 }
 0x178   :  { %2042 = vmatpush2.bf16.msra.mxu0 %v2562_v50  ;;  %2085 = vmatpush2.bf16.msra.mxu1 %v2565_v51  ;;  %p2674_p10 = pnand %p2673_p9, %p2667_p6 }
 0x179   :  { %v969_v60 = vpop.f32.mrf.mxu0  ;;  %2043 = vmatprep.subr.bf16.mxu0 %v2570_v52  ;;  %v1012_v63 = vpop.f32.mrf.mxu1  ;;  %2086 = vmatprep.subr.bf16.mxu1 %v2573_v54 }
 0x17b   :  { %v971_v3 = vpop.f32.mrf.mxu0  ;;  %v1014_v5 = vpop.f32.mrf.mxu1 }
 0x17c   :  { %2044 = vmatpush2.bf16.msra.mxu0 %v2568_v59  ;;  %2087 = vmatpush2.bf16.msra.mxu1 %v2571_v61 }
 0x17d   :  { %v973_v7 = vpop.f32.mrf.mxu0  ;;  %2045 = vmatprep.subr.bf16.mxu0 %v2576_v13  ;;  %v1016_v17 = vpop.f32.mrf.mxu1  ;;  %2088 = vmatprep.subr.bf16.mxu1 %v2579_v2 }
 0x17e   :  { %v1025_v15 = vpack.c.bf16 %v973_v7, %v969_v60  ;;  %v1027_v21 = vpack.c.bf16 %v1016_v17, %v1012_v63 }
 0x17f   :  { %v975_v22 = vpop.f32.mrf.mxu0  ;;  %v1018_v24 = vpop.f32.mrf.mxu1 }
 0x180   :  { %v1026_v14 = vpack.c.bf16 %v975_v22, %v971_v3  ;;  %2046 = vmatpush2.bf16.msra.mxu0 %v2574_v6  ;;  %v1139_v26 = vadd.bf16 %v1113_v8, %v1025_v15  ;;  %v1028_v27 = vpack.c.bf16 %v1018_v24, %v1014_v5  ;;  %2089 = vmatpush2.bf16.msra.mxu1 %v2577_v9 }
 0x181   :  { %2047 = vmatprep.subr.bf16.mxu0 %v2582_v10  ;;  %v1141_v29 = vadd.bf16 %v1127_v18, %v1027_v21  ;;  %2090 = vmatprep.subr.bf16.mxu1 %v2585_v20 }
 0x182   :  { %v1140_v30 = vadd.bf16 %v1120_v19, %v1026_v14  ;;  %v1142_v31 = vadd.bf16 %v1134_v23, %v1028_v27  ;;  %v1147_v33 = vmax.bf16 %v2704_v48, %v1139_v26 }
 0x183   :  { %v1149_v35 = vmax.bf16 %v2704_v48, %v1141_v29 }
 0x184   :  { %2048 = vmatpush2.bf16.msra.mxu0 %v2580_v25  ;;  %v1148_v32 = vmax.bf16 %v2704_v48, %v1140_v30  ;;  %2091 = vmatpush2.bf16.msra.mxu1 %v2583_v28  ;;  %v1150_v34 = vmax.bf16 %v2704_v48, %v1142_v31 }
 0x186   :  { %2049 = vmatprep.mubr.bf16.mxu0 %v1148_v32  ;;  %2092 = vmatprep.mubr.bf16.mxu1 %v1150_v34 }
 0x187   :  { %2050 = vmatmul.mubr.bf16.vlgmr.msra.gmra.mxu0 %v1147_v33  ;;  %2093 = vmatmul.mubr.bf16.vlgmr.msra.gmra.mxu1 %v1149_v35 }
 0x207   :  { %v1965_v36 = vpop.f32.mrf.mxu0  ;;  %v2008_v37 = vpop.f32.mrf.mxu1 }
 0x208   :  { %v1966_v44 = vadd.f32 %v1965_v36, %v1284_v40 }
 0x209   :  { %v1967_v39 = vpop.f32.mrf.mxu0  ;;  %v2010_v41 = vpop.f32.mrf.mxu1 }
 0x20a   :  { %v1968_v58 = vadd.f32 %v1967_v39, %v1288_v42  ;;  %v2009_v46 = vadd.f32 %v2008_v37, %v1966_v44 }
 0x20b   :  { %v1969_v43 = vpop.f32.mrf.mxu0  ;;  %v2012_v48 = vpop.f32.mrf.mxu1 }
 0x20c   :  { %v1970_v47 = vadd.f32 %v1969_v43, %v1284_v40  ;;  %v2011_v51 = vadd.f32 %v2010_v41, %v1968_v58 }
 0x20d   :  { %v1971_v45 = vpop.f32.mrf.mxu0  ;;  %v2014_v49 = vpop.f32.mrf.mxu1 }
 0x20e   :  { %v1972_v52 = vadd.f32 %v1971_v45, %v1288_v42  ;;  %v2013_v56 = vadd.f32 %v2012_v48, %v1970_v47 }
 0x210   :  { %v2015_v16 = vadd.f32 %v2014_v49, %v1972_v52 }
 0x247   :  { %v2051_v50 = vpop.f32.mrf.mxu0  ;;  %v2094_v54 = vpop.f32.mrf.mxu1 }
 0x248   :  { %v2052_v53 = vadd.f32 %v2051_v50, %v2009_v46 }
 0x249   :  { %v2053_v55 = vpop.f32.mrf.mxu0  ;;  %v2096_v59 = vpop.f32.mrf.mxu1 }
 0x24a   :  { %v2095_v12 = vadd.f32 %v2094_v54, %v2052_v53  ;;  %v2054_v57 = vadd.f32 %v2053_v55, %v2011_v51 }
 0x24b   :  { %v2055_v11 = vpop.f32.mrf.mxu0  ;;  %v2098_v62 = vpop.f32.mrf.mxu1 }
 0x24c   :  { %2103 = vst [vmem:[#allocation10] sm:$0xff] %v2095_v12  ;;  %v2097_v60 = vadd.f32 %v2096_v59, %v2054_v57  ;;  %v2056_v61 = vadd.f32 %v2055_v11, %v2013_v56 }
 0x24d   :  { %v2057_v13 = vpop.f32.mrf.mxu0  ;;  %v2100_v1 = vpop.f32.mrf.mxu1 }
 0x24e   :  { %2104 = vst [vmem:[#allocation10 + $0x8] sm:$0xff] %v2097_v60  ;;  %v2099_v63 = vadd.f32 %v2098_v62, %v2056_v61  ;;  %v2058_v0 = vadd.f32 %v2057_v13, %v2015_v16 }
 0x250   :  { %2105 = vst [vmem:[#allocation10 + $0x10] sm:$0xff] %v2099_v63  ;;  %v2101_v2 = vadd.f32 %v2100_v1, %v2058_v0 }
 0x252   :  { %2106 = vst [vmem:[#allocation10 + $0x18] sm:$0xff] %v2101_v2 }
 0x253   :  { %2677 = shalt.err (!%p2674_p10)
}
 0x254   :  { %2118 = dma.vmem_to_hbm [thread:$0]  %s2113_s17, 512, %s2821_s5, [#allocation4], %s2698_s28, %s2698_s28, %s2699_s29  }
 0x255   :  { %2692 = dma.done.wait [#allocation4], 512  }
 0x256   :  { %2693 = vsyncadd [#allocation4], 4294966784 }
 0x257   :  { %2122 = vsyncpa [#allocation3], 1 }
 0x258   :  { %2123 = vsyncpa [#allocation6], 1 }
 0x259   :  { %2124 = vsyncpa [#allocation9], 1 }
 0x25a   :  { %2125 = vsyncpa [#allocation4], 1 }

</bundles_post_ra>
